<compile_context>
chip_gen: v6e
topology: v6e:2x2x1
jax: 0.10.0
libtpu: 0.0.40
codegen_flags: <defaults>
</compile_context>

<pallas_src>
import math
import jax
import jax.numpy as jnp
from jax import lax
from jax.experimental import pallas as pl
from jax.experimental.pallas import tpu as pltpu


# ----------------------------- fused attention kernel ------------------------------
def _make_kernel(b_tile, n, heads, hidden, emb, mxu_dtype, flatten_out):
    H = heads * hidden
    M = b_tile * n
    NEG = -1e30                   # finite "minus infinity" for masked scores

    def kernel(x_ref, wqkv_ref, wu_ref, bu_ref, o_ref):
        # ---- fused Q/K/V projection: one wide (M, emb) @ (emb, 3H) MXU matmul ----
        x2 = x_ref[...].reshape(M, emb).astype(mxu_dtype)        # leading-dim merge: free
        qkv = jnp.dot(x2, wqkv_ref[...],
                      preferred_element_type=jnp.float32)        # (M, 3H) f32

        wu_all = wu_ref[...]                                     # (H, emb), loaded once

        # causal mask (mask=True, att_type='all' with arange timestamps)
        row = lax.broadcasted_iota(jnp.int32, (n, n), 0)
        col = lax.broadcasted_iota(jnp.int32, (n, n), 1)
        causal = (row >= col)[None, :, :]                        # (1, n, n)

        y = jnp.zeros((M, emb), jnp.float32)
        for h in range(heads):                                   # unrolled at trace time
            # static lane slices of the projection output (no transposes)
            q_h = qkv[:,         h * hidden:(h + 1) * hidden].astype(mxu_dtype)
            k_h = qkv[:,     H + h * hidden:H + (h + 1) * hidden].astype(mxu_dtype)
            v_h = qkv[:, 2 * H + h * hidden:2 * H + (h + 1) * hidden].astype(mxu_dtype)
            q_h = q_h.reshape(b_tile, n, hidden)                 # leading-dim split: free
            k_h = k_h.reshape(b_tile, n, hidden)
            v_h = v_h.reshape(b_tile, n, hidden)

            # scores, batched over B_TILE on the leading dim (both q,k scalings are
            # pre-folded into the packed w_queries weight)
            s = jnp.einsum("bqd,bkd->bqk", q_h, k_h,
                           preferred_element_type=jnp.float32)   # (b_tile, n, n) f32
            s = jnp.where(causal, s, NEG)

            # numerically-stable softmax in f32; EUP reciprocal off the VALU path
            m = jnp.max(s, axis=-1, keepdims=True)
            e = jnp.exp(s - m)
            p = e * pl.reciprocal(jnp.sum(e, axis=-1, keepdims=True), approx=True)

            o_h = jnp.einsum("bqk,bkd->bqd", p.astype(mxu_dtype), v_h,
                             preferred_element_type=jnp.float32)  # (b_tile, n, hidden)

            # unifyheads contribution of this head (replaces head-concat transpose)
            y = y + jnp.dot(o_h.reshape(M, hidden).astype(mxu_dtype),
                            wu_all[h * hidden:(h + 1) * hidden, :],
                            preferred_element_type=jnp.float32)   # (M, emb) f32

        y = y + bu_ref[...]                                       # (1, emb) bias broadcast

        if flatten_out:
            # lane-dense store: pack each batch element's n rows of emb lanes into one
            # n*emb-lane row via sublane slices + lane concat (no risky shape-cast).
            y3 = y.reshape(b_tile, n, emb)                         # sublane-tile split: free
            yflat = jnp.concatenate([y3[:, i, :] for i in range(n)], axis=-1)
            o_ref[...] = yflat[:, None, :].astype(o_ref.dtype)     # (b_tile, 1, n*emb)
        else:
            o_ref[...] = y.reshape(b_tile, n, emb).astype(o_ref.dtype)

    return kernel


def self_attention_forward(x, packed, heads, hidden, *, b_tile=None,
                           out_dtype=jnp.float32, flatten_out=None):
    """x: (bs, n, emb); packed = (wqkv (emb, 3H), wu (H, emb), bu (1, emb))."""
    wqkv, wu, bu = packed
    bs, n, emb = x.shape
    H = heads * hidden
    assert wqkv.shape == (emb, 3 * H) and wu.shape == (H, emb) and bu.shape == (1, emb)

    # Batch tile: fatten the MXU M dim (target >= 128 rows, v5e MXU height) with as
    # few grid steps as possible; must divide bs so blocks stay rectangular.
    if b_tile is None:
        b_tile = min(bs, max(1, -(-128 // n)))
        while bs % b_tile:
            b_tile -= 1
    assert bs % b_tile == 0
    grid = (bs // b_tile,)

    if flatten_out is None:
        # lane-dense output only needed (and cheap to build) for small rows
        flatten_out = (emb % 128 != 0) and (n % 8 == 0) and (n <= 64)

    kernel = _make_kernel(b_tile, n, heads, hidden, emb, wqkv.dtype, flatten_out)

    if flatten_out:
        out_shape = jax.ShapeDtypeStruct((bs, 1, n * emb), out_dtype)
        out_spec = pl.BlockSpec((b_tile, 1, n * emb), lambda b: (b, 0, 0))
    else:
        out_shape = jax.ShapeDtypeStruct((bs, n, emb), out_dtype)
        out_spec = pl.BlockSpec((b_tile, n, emb), lambda b: (b, 0, 0))

    out = pl.pallas_call(
        kernel,
        out_shape=out_shape,
        grid_spec=pltpu.PrefetchScalarGridSpec(
            num_scalar_prefetch=0,
            grid=grid,
            in_specs=[
                pl.BlockSpec((b_tile, n, emb), lambda b: (b, 0, 0)),
                # constant-index weight blocks: DMA'd once, kept VMEM-resident
                pl.BlockSpec((emb, 3 * H), lambda b: (0, 0)),
                pl.BlockSpec((H, emb), lambda b: (0, 0)),
                pl.BlockSpec((1, emb), lambda b: (0, 0)),
            ],
            out_specs=out_spec,
        ),
        compiler_params=pltpu.CompilerParams(
            dimension_semantics=("parallel",),        # megacore sharding over batch tiles
            vmem_limit_bytes=64 * 1024 * 1024,        # explicit (above 16/32 MiB defaults)
        ),
    )(x, wqkv, wu, bu)

    if flatten_out:
        # (bs, 1, n*emb) and (bs, n, emb) share the same row-major HBM layout -> free
        out = out.reshape(bs, n, emb)
    return out


# ----------------------------- one-time weight packing ------------------------------
def pack_params(params, heads, hidden, mxu_dtype=jnp.bfloat16):
    """Pre-pack PyTorch-layout weights once (outside the forward path).

    w_{queries,keys,values}: (heads*hidden, emb) -> packed (emb, 3*heads*hidden).
    Both hidden**-0.5 scalings are folded into the query columns (exact in bf16 for
    power-of-two hidden).  unify_w: (emb, H) -> (H, emb);  unify_b: (emb,) -> (1, emb).
    """
    scale = 1.0 / hidden
    wq = params["w_queries"].T * scale
    wk = params["w_keys"].T
    wv = params["w_values"].T
    wqkv = jnp.concatenate([wq, wk, wv], axis=1).astype(mxu_dtype)
    wu = params["unify_w"].T.astype(mxu_dtype)
    bu = params["unify_b"].reshape(1, -1).astype(jnp.float32)
    return wqkv, wu, bu


# ----------------------------- pure-JAX reference (f32) -----------------------------
def self_attention_ref(x, params, heads, hidden):
    bs, n, emb = x.shape
    def proj(w):
        return x @ w.T
    q = proj(params["w_queries"]).reshape(bs, n, heads, hidden).transpose(0, 2, 1, 3)
    k = proj(params["w_keys"]).reshape(bs, n, heads, hidden).transpose(0, 2, 1, 3)
    v = proj(params["w_values"]).reshape(bs, n, heads, hidden).transpose(0, 2, 1, 3)
    q = q / math.sqrt(hidden)
    k = k / math.sqrt(hidden)
    dot = jnp.einsum("bhqd,bhkd->bhqk", q, k)
    mask = jnp.tril(jnp.ones((n, n), bool))
    dot = jnp.where(mask, dot, -jnp.inf)
    p = jax.nn.softmax(dot, axis=-1)
    o = jnp.einsum("bhqk,bhkd->bhqd", p, v)
    o = o.transpose(0, 2, 1, 3).reshape(bs, n, heads * hidden)
    return o @ params["unify_w"].T + params["unify_b"]


if __name__ == "__main__":
    # small shapes consistent with the module
    bs, n, emb = 2, 8, 32
    heads, hidden = 8, 16

    key = jax.random.PRNGKey(0)
    kx, k1, k2, k3, k4, k5 = jax.random.split(key, 6)

    x = jax.random.normal(kx, (bs, n, emb), jnp.float32)

    # deterministic PyTorch-Linear-style init (uniform(-1/sqrt(fan_in), 1/sqrt(fan_in)))
    lim_e = 1.0 / math.sqrt(emb)
    lim_h = 1.0 / math.sqrt(heads * hidden)
    params = {
        "w_keys":    jax.random.uniform(k1, (heads * hidden, emb), jnp.float32, -lim_e, lim_e),
        "w_queries": jax.random.uniform(k2, (heads * hidden, emb), jnp.float32, -lim_e, lim_e),
        "w_values":  jax.random.uniform(k3, (heads * hidden, emb), jnp.float32, -lim_e, lim_e),
        "unify_w":   jax.random.uniform(k4, (emb, heads * hidden), jnp.float32, -lim_h, lim_h),
        "unify_b":   jax.random.uniform(k5, (emb,), jnp.float32, -lim_h, lim_h),
    }

    # pack weights once (bf16 MXU operands, f32 accumulation inside the kernel)
    packed = pack_params(params, heads, hidden, mxu_dtype=jnp.bfloat16)

    y = self_attention_forward(x, packed, heads, hidden)
    y = jax.block_until_ready(y)

    y_ref = self_attention_ref(x, params, heads, hidden)
    assert y.shape == (bs, n, emb)
    # bf16 MXU operands + approx reciprocal -> bf16-level tolerance vs f32 reference
    assert jnp.allclose(y, y_ref, atol=5e-2, rtol=5e-2), "mismatch vs reference"

    print("KERNEL_OK")
</pallas_src>

<mosaic_0001>
module attributes {stable_mosaic.version = 11 : i64} {
  func.func @kernel(%arg0: i32, %arg1: memref<2x8x32xf32, #tpu.memory_space<vmem>>, %arg2: memref<32x384xbf16, #tpu.memory_space<vmem>>, %arg3: memref<128x32xbf16, #tpu.memory_space<vmem>>, %arg4: memref<1x32xf32, #tpu.memory_space<vmem>>, %arg5: memref<2x1x256xf32, #tpu.memory_space<vmem>>) attributes {dimension_semantics = [#tpu.dimension_semantics<parallel>], iteration_bounds = array<i64: 1>, scalar_prefetch = 0 : i64, scratch_operands = 0 : i64, tpu.core_type = #tpu.core_type<tc>, window_params = [{transform_indices = @transform_0, window_bounds = array<i64: 2, 8, 32>}, {pipeline_mode = #tpu.pipeline_mode<synchronous>, transform_indices = @transform_1, window_bounds = array<i64: 32, 384>}, {pipeline_mode = #tpu.pipeline_mode<synchronous>, transform_indices = @transform_2, window_bounds = array<i64: 128, 32>}, {pipeline_mode = #tpu.pipeline_mode<synchronous>, transform_indices = @transform_3, window_bounds = array<i64: 1, 32>}, {transform_indices = @transform_4, window_bounds = array<i64: 2, 1, 256>}]} {
    %c0 = arith.constant 0 : index
    %c0_0 = arith.constant 0 : index
    %c0_1 = arith.constant 0 : index
    %0 = vector.load %arg1[%c0, %c0_0, %c0_1] : memref<2x8x32xf32, #tpu.memory_space<vmem>>, vector<2x8x32xf32>
    %1 = vector.shape_cast %0 : vector<2x8x32xf32> to vector<16x32xf32>
    %2 = arith.truncf %1 : vector<16x32xf32> to vector<16x32xbf16>
    %c0_2 = arith.constant 0 : index
    %c0_3 = arith.constant 0 : index
    %3 = vector.load %arg2[%c0_2, %c0_3] : memref<32x384xbf16, #tpu.memory_space<vmem>>, vector<32x384xbf16>
    %cst = arith.constant dense<0.000000e+00> : vector<16x384xf32>
    %4 = tpu.matmul %2, %3, %cst {dimension_numbers = #tpu.dot_dimension_numbers<[1], [0], [0], [1], [0, 0, 1, 1], [], []>} : vector<16x32xbf16>, vector<32x384xbf16>, vector<16x384xf32> -> vector<16x384xf32>
    %c0_4 = arith.constant 0 : index
    %c0_5 = arith.constant 0 : index
    %5 = vector.load %arg3[%c0_4, %c0_5] : memref<128x32xbf16, #tpu.memory_space<vmem>>, vector<128x32xbf16>
    %6 = tpu.iota {dimensions = array<i32: 0>} : vector<8x8xi32>
    %7 = tpu.iota {dimensions = array<i32: 1>} : vector<8x8xi32>
    %8 = arith.cmpi sge, %6, %7 : vector<8x8xi32>
    %9 = vector.shape_cast %8 : vector<8x8xi1> to vector<1x8x8xi1>
    %cst_6 = arith.constant 0.000000e+00 : f32
    %10 = vector.broadcast %cst_6 : f32 to vector<16x32xf32>
    %11 = vector.extract_strided_slice %4 {offsets = [0, 0], sizes = [16, 16], strides = [1, 1]} : vector<16x384xf32> to vector<16x16xf32>
    %12 = arith.truncf %11 : vector<16x16xf32> to vector<16x16xbf16>
    %13 = vector.extract_strided_slice %4 {offsets = [0, 128], sizes = [16, 16], strides = [1, 1]} : vector<16x384xf32> to vector<16x16xf32>
    %14 = arith.truncf %13 : vector<16x16xf32> to vector<16x16xbf16>
    %15 = vector.extract_strided_slice %4 {offsets = [0, 256], sizes = [16, 16], strides = [1, 1]} : vector<16x384xf32> to vector<16x16xf32>
    %16 = arith.truncf %15 : vector<16x16xf32> to vector<16x16xbf16>
    %17 = vector.shape_cast %12 : vector<16x16xbf16> to vector<2x8x16xbf16>
    %18 = vector.shape_cast %14 : vector<16x16xbf16> to vector<2x8x16xbf16>
    %19 = vector.shape_cast %16 : vector<16x16xbf16> to vector<2x8x16xbf16>
    "tpu.trace_start"() <{level = 10 : i32, message = "bqd,bkd->bqk"}> : () -> ()
    %cst_7 = arith.constant dense<0.000000e+00> : vector<2x8x8xf32>
    %20 = tpu.matmul %17, %18, %cst_7 {dimension_numbers = #tpu.dot_dimension_numbers<[2], [2], [1], [1], [0, 0, 0, 1, 1, 1], [0], [0]>} : vector<2x8x16xbf16>, vector<2x8x16xbf16>, vector<2x8x8xf32> -> vector<2x8x8xf32>
    %cst_8 = arith.constant -1.000000e+30 : f32
    "tpu.trace_stop"() : () -> ()
    %21 = vector.shape_cast %9 : vector<1x8x8xi1> to vector<1x8x8xi1>
    %22 = vector.broadcast %21 : vector<1x8x8xi1> to vector<2x8x8xi1>
    %23 = vector.broadcast %cst_8 : f32 to vector<2x8x8xf32>
    %24 = arith.select %22, %20, %23 : vector<2x8x8xi1>, vector<2x8x8xf32>
    %cst_9 = arith.constant dense<0xFF800000> : vector<2x8xf32>
    %25 = vector.multi_reduction <maximumf>, %24, %cst_9 [2] : vector<2x8x8xf32> to vector<2x8xf32>
    %26 = vector.shape_cast %25 : vector<2x8xf32> to vector<2x8x1xf32>
    %27 = vector.broadcast %26 : vector<2x8x1xf32> to vector<2x8x8xf32>
    %28 = arith.subf %24, %27 : vector<2x8x8xf32>
    %29 = math.exp %28 : vector<2x8x8xf32>
    %cst_10 = arith.constant dense<0.000000e+00> : vector<2x8xf32>
    %30 = vector.multi_reduction <add>, %29, %cst_10 [2] : vector<2x8x8xf32> to vector<2x8xf32>
    %31 = vector.shape_cast %30 : vector<2x8xf32> to vector<2x8x1xf32>
    %32 = tpu.reciprocal %31 {approx = true} : vector<2x8x1xf32> -> vector<2x8x1xf32>
    %33 = vector.broadcast %32 : vector<2x8x1xf32> to vector<2x8x8xf32>
    %34 = arith.mulf %29, %33 : vector<2x8x8xf32>
    %35 = arith.truncf %34 : vector<2x8x8xf32> to vector<2x8x8xbf16>
    "tpu.trace_start"() <{level = 10 : i32, message = "bqk,bkd->bqd"}> : () -> ()
    %cst_11 = arith.constant dense<0.000000e+00> : vector<2x8x16xf32>
    %36 = tpu.matmul %35, %19, %cst_11 {dimension_numbers = #tpu.dot_dimension_numbers<[2], [1], [1], [2], [0, 0, 0, 1, 1, 2], [0], [0]>} : vector<2x8x8xbf16>, vector<2x8x16xbf16>, vector<2x8x16xf32> -> vector<2x8x16xf32>
    "tpu.trace_stop"() : () -> ()
    %37 = vector.shape_cast %36 : vector<2x8x16xf32> to vector<16x16xf32>
    %38 = arith.truncf %37 : vector<16x16xf32> to vector<16x16xbf16>
    %39 = vector.extract_strided_slice %5 {offsets = [0, 0], sizes = [16, 32], strides = [1, 1]} : vector<128x32xbf16> to vector<16x32xbf16>
    %cst_12 = arith.constant dense<0.000000e+00> : vector<16x32xf32>
    %40 = tpu.matmul %38, %39, %cst_12 {dimension_numbers = #tpu.dot_dimension_numbers<[1], [0], [0], [1], [0, 0, 1, 1], [], []>} : vector<16x16xbf16>, vector<16x32xbf16>, vector<16x32xf32> -> vector<16x32xf32>
    %41 = arith.addf %10, %40 : vector<16x32xf32>
    %42 = vector.extract_strided_slice %4 {offsets = [0, 16], sizes = [16, 16], strides = [1, 1]} : vector<16x384xf32> to vector<16x16xf32>
    %43 = arith.truncf %42 : vector<16x16xf32> to vector<16x16xbf16>
    %44 = vector.extract_strided_slice %4 {offsets = [0, 144], sizes = [16, 16], strides = [1, 1]} : vector<16x384xf32> to vector<16x16xf32>
    %45 = arith.truncf %44 : vector<16x16xf32> to vector<16x16xbf16>
    %46 = vector.extract_strided_slice %4 {offsets = [0, 272], sizes = [16, 16], strides = [1, 1]} : vector<16x384xf32> to vector<16x16xf32>
    %47 = arith.truncf %46 : vector<16x16xf32> to vector<16x16xbf16>
    %48 = vector.shape_cast %43 : vector<16x16xbf16> to vector<2x8x16xbf16>
    %49 = vector.shape_cast %45 : vector<16x16xbf16> to vector<2x8x16xbf16>
    %50 = vector.shape_cast %47 : vector<16x16xbf16> to vector<2x8x16xbf16>
    "tpu.trace_start"() <{level = 10 : i32, message = "bqd,bkd->bqk"}> : () -> ()
    %cst_13 = arith.constant dense<0.000000e+00> : vector<2x8x8xf32>
    %51 = tpu.matmul %48, %49, %cst_13 {dimension_numbers = #tpu.dot_dimension_numbers<[2], [2], [1], [1], [0, 0, 0, 1, 1, 1], [0], [0]>} : vector<2x8x16xbf16>, vector<2x8x16xbf16>, vector<2x8x8xf32> -> vector<2x8x8xf32>
    %cst_14 = arith.constant -1.000000e+30 : f32
    "tpu.trace_stop"() : () -> ()
    %52 = vector.shape_cast %9 : vector<1x8x8xi1> to vector<1x8x8xi1>
    %53 = vector.broadcast %52 : vector<1x8x8xi1> to vector<2x8x8xi1>
    %54 = vector.broadcast %cst_14 : f32 to vector<2x8x8xf32>
    %55 = arith.select %53, %51, %54 : vector<2x8x8xi1>, vector<2x8x8xf32>
    %cst_15 = arith.constant dense<0xFF800000> : vector<2x8xf32>
    %56 = vector.multi_reduction <maximumf>, %55, %cst_15 [2] : vector<2x8x8xf32> to vector<2x8xf32>
    %57 = vector.shape_cast %56 : vector<2x8xf32> to vector<2x8x1xf32>
    %58 = vector.broadcast %57 : vector<2x8x1xf32> to vector<2x8x8xf32>
    %59 = arith.subf %55, %58 : vector<2x8x8xf32>
    %60 = math.exp %59 : vector<2x8x8xf32>
    %cst_16 = arith.constant dense<0.000000e+00> : vector<2x8xf32>
    %61 = vector.multi_reduction <add>, %60, %cst_16 [2] : vector<2x8x8xf32> to vector<2x8xf32>
    %62 = vector.shape_cast %61 : vector<2x8xf32> to vector<2x8x1xf32>
    %63 = tpu.reciprocal %62 {approx = true} : vector<2x8x1xf32> -> vector<2x8x1xf32>
    %64 = vector.broadcast %63 : vector<2x8x1xf32> to vector<2x8x8xf32>
    %65 = arith.mulf %60, %64 : vector<2x8x8xf32>
    %66 = arith.truncf %65 : vector<2x8x8xf32> to vector<2x8x8xbf16>
    "tpu.trace_start"() <{level = 10 : i32, message = "bqk,bkd->bqd"}> : () -> ()
    %cst_17 = arith.constant dense<0.000000e+00> : vector<2x8x16xf32>
    %67 = tpu.matmul %66, %50, %cst_17 {dimension_numbers = #tpu.dot_dimension_numbers<[2], [1], [1], [2], [0, 0, 0, 1, 1, 2], [0], [0]>} : vector<2x8x8xbf16>, vector<2x8x16xbf16>, vector<2x8x16xf32> -> vector<2x8x16xf32>
    "tpu.trace_stop"() : () -> ()
    %68 = vector.shape_cast %67 : vector<2x8x16xf32> to vector<16x16xf32>
    %69 = arith.truncf %68 : vector<16x16xf32> to vector<16x16xbf16>
    %70 = vector.extract_strided_slice %5 {offsets = [16, 0], sizes = [16, 32], strides = [1, 1]} : vector<128x32xbf16> to vector<16x32xbf16>
    %cst_18 = arith.constant dense<0.000000e+00> : vector<16x32xf32>
    %71 = tpu.matmul %69, %70, %cst_18 {dimension_numbers = #tpu.dot_dimension_numbers<[1], [0], [0], [1], [0, 0, 1, 1], [], []>} : vector<16x16xbf16>, vector<16x32xbf16>, vector<16x32xf32> -> vector<16x32xf32>
    %72 = arith.addf %41, %71 : vector<16x32xf32>
    %73 = vector.extract_strided_slice %4 {offsets = [0, 32], sizes = [16, 16], strides = [1, 1]} : vector<16x384xf32> to vector<16x16xf32>
    %74 = arith.truncf %73 : vector<16x16xf32> to vector<16x16xbf16>
    %75 = vector.extract_strided_slice %4 {offsets = [0, 160], sizes = [16, 16], strides = [1, 1]} : vector<16x384xf32> to vector<16x16xf32>
    %76 = arith.truncf %75 : vector<16x16xf32> to vector<16x16xbf16>
    %77 = vector.extract_strided_slice %4 {offsets = [0, 288], sizes = [16, 16], strides = [1, 1]} : vector<16x384xf32> to vector<16x16xf32>
    %78 = arith.truncf %77 : vector<16x16xf32> to vector<16x16xbf16>
    %79 = vector.shape_cast %74 : vector<16x16xbf16> to vector<2x8x16xbf16>
    %80 = vector.shape_cast %76 : vector<16x16xbf16> to vector<2x8x16xbf16>
    %81 = vector.shape_cast %78 : vector<16x16xbf16> to vector<2x8x16xbf16>
    "tpu.trace_start"() <{level = 10 : i32, message = "bqd,bkd->bqk"}> : () -> ()
    %cst_19 = arith.constant dense<0.000000e+00> : vector<2x8x8xf32>
    %82 = tpu.matmul %79, %80, %cst_19 {dimension_numbers = #tpu.dot_dimension_numbers<[2], [2], [1], [1], [0, 0, 0, 1, 1, 1], [0], [0]>} : vector<2x8x16xbf16>, vector<2x8x16xbf16>, vector<2x8x8xf32> -> vector<2x8x8xf32>
    %cst_20 = arith.constant -1.000000e+30 : f32
    "tpu.trace_stop"() : () -> ()
    %83 = vector.shape_cast %9 : vector<1x8x8xi1> to vector<1x8x8xi1>
    %84 = vector.broadcast %83 : vector<1x8x8xi1> to vector<2x8x8xi1>
    %85 = vector.broadcast %cst_20 : f32 to vector<2x8x8xf32>
    %86 = arith.select %84, %82, %85 : vector<2x8x8xi1>, vector<2x8x8xf32>
    %cst_21 = arith.constant dense<0xFF800000> : vector<2x8xf32>
    %87 = vector.multi_reduction <maximumf>, %86, %cst_21 [2] : vector<2x8x8xf32> to vector<2x8xf32>
    %88 = vector.shape_cast %87 : vector<2x8xf32> to vector<2x8x1xf32>
    %89 = vector.broadcast %88 : vector<2x8x1xf32> to vector<2x8x8xf32>
    %90 = arith.subf %86, %89 : vector<2x8x8xf32>
    %91 = math.exp %90 : vector<2x8x8xf32>
    %cst_22 = arith.constant dense<0.000000e+00> : vector<2x8xf32>
    %92 = vector.multi_reduction <add>, %91, %cst_22 [2] : vector<2x8x8xf32> to vector<2x8xf32>
    %93 = vector.shape_cast %92 : vector<2x8xf32> to vector<2x8x1xf32>
    %94 = tpu.reciprocal %93 {approx = true} : vector<2x8x1xf32> -> vector<2x8x1xf32>
    %95 = vector.broadcast %94 : vector<2x8x1xf32> to vector<2x8x8xf32>
    %96 = arith.mulf %91, %95 : vector<2x8x8xf32>
    %97 = arith.truncf %96 : vector<2x8x8xf32> to vector<2x8x8xbf16>
    "tpu.trace_start"() <{level = 10 : i32, message = "bqk,bkd->bqd"}> : () -> ()
    %cst_23 = arith.constant dense<0.000000e+00> : vector<2x8x16xf32>
    %98 = tpu.matmul %97, %81, %cst_23 {dimension_numbers = #tpu.dot_dimension_numbers<[2], [1], [1], [2], [0, 0, 0, 1, 1, 2], [0], [0]>} : vector<2x8x8xbf16>, vector<2x8x16xbf16>, vector<2x8x16xf32> -> vector<2x8x16xf32>
    "tpu.trace_stop"() : () -> ()
    %99 = vector.shape_cast %98 : vector<2x8x16xf32> to vector<16x16xf32>
    %100 = arith.truncf %99 : vector<16x16xf32> to vector<16x16xbf16>
    %101 = vector.extract_strided_slice %5 {offsets = [32, 0], sizes = [16, 32], strides = [1, 1]} : vector<128x32xbf16> to vector<16x32xbf16>
    %cst_24 = arith.constant dense<0.000000e+00> : vector<16x32xf32>
    %102 = tpu.matmul %100, %101, %cst_24 {dimension_numbers = #tpu.dot_dimension_numbers<[1], [0], [0], [1], [0, 0, 1, 1], [], []>} : vector<16x16xbf16>, vector<16x32xbf16>, vector<16x32xf32> -> vector<16x32xf32>
    %103 = arith.addf %72, %102 : vector<16x32xf32>
    %104 = vector.extract_strided_slice %4 {offsets = [0, 48], sizes = [16, 16], strides = [1, 1]} : vector<16x384xf32> to vector<16x16xf32>
    %105 = arith.truncf %104 : vector<16x16xf32> to vector<16x16xbf16>
    %106 = vector.extract_strided_slice %4 {offsets = [0, 176], sizes = [16, 16], strides = [1, 1]} : vector<16x384xf32> to vector<16x16xf32>
    %107 = arith.truncf %106 : vector<16x16xf32> to vector<16x16xbf16>
    %108 = vector.extract_strided_slice %4 {offsets = [0, 304], sizes = [16, 16], strides = [1, 1]} : vector<16x384xf32> to vector<16x16xf32>
    %109 = arith.truncf %108 : vector<16x16xf32> to vector<16x16xbf16>
    %110 = vector.shape_cast %105 : vector<16x16xbf16> to vector<2x8x16xbf16>
    %111 = vector.shape_cast %107 : vector<16x16xbf16> to vector<2x8x16xbf16>
    %112 = vector.shape_cast %109 : vector<16x16xbf16> to vector<2x8x16xbf16>
    "tpu.trace_start"() <{level = 10 : i32, message = "bqd,bkd->bqk"}> : () -> ()
    %cst_25 = arith.constant dense<0.000000e+00> : vector<2x8x8xf32>
    %113 = tpu.matmul %110, %111, %cst_25 {dimension_numbers = #tpu.dot_dimension_numbers<[2], [2], [1], [1], [0, 0, 0, 1, 1, 1], [0], [0]>} : vector<2x8x16xbf16>, vector<2x8x16xbf16>, vector<2x8x8xf32> -> vector<2x8x8xf32>
    %cst_26 = arith.constant -1.000000e+30 : f32
    "tpu.trace_stop"() : () -> ()
    %114 = vector.shape_cast %9 : vector<1x8x8xi1> to vector<1x8x8xi1>
    %115 = vector.broadcast %114 : vector<1x8x8xi1> to vector<2x8x8xi1>
    %116 = vector.broadcast %cst_26 : f32 to vector<2x8x8xf32>
    %117 = arith.select %115, %113, %116 : vector<2x8x8xi1>, vector<2x8x8xf32>
    %cst_27 = arith.constant dense<0xFF800000> : vector<2x8xf32>
    %118 = vector.multi_reduction <maximumf>, %117, %cst_27 [2] : vector<2x8x8xf32> to vector<2x8xf32>
    %119 = vector.shape_cast %118 : vector<2x8xf32> to vector<2x8x1xf32>
    %120 = vector.broadcast %119 : vector<2x8x1xf32> to vector<2x8x8xf32>
    %121 = arith.subf %117, %120 : vector<2x8x8xf32>
    %122 = math.exp %121 : vector<2x8x8xf32>
    %cst_28 = arith.constant dense<0.000000e+00> : vector<2x8xf32>
    %123 = vector.multi_reduction <add>, %122, %cst_28 [2] : vector<2x8x8xf32> to vector<2x8xf32>
    %124 = vector.shape_cast %123 : vector<2x8xf32> to vector<2x8x1xf32>
    %125 = tpu.reciprocal %124 {approx = true} : vector<2x8x1xf32> -> vector<2x8x1xf32>
    %126 = vector.broadcast %125 : vector<2x8x1xf32> to vector<2x8x8xf32>
    %127 = arith.mulf %122, %126 : vector<2x8x8xf32>
    %128 = arith.truncf %127 : vector<2x8x8xf32> to vector<2x8x8xbf16>
    "tpu.trace_start"() <{level = 10 : i32, message = "bqk,bkd->bqd"}> : () -> ()
    %cst_29 = arith.constant dense<0.000000e+00> : vector<2x8x16xf32>
    %129 = tpu.matmul %128, %112, %cst_29 {dimension_numbers = #tpu.dot_dimension_numbers<[2], [1], [1], [2], [0, 0, 0, 1, 1, 2], [0], [0]>} : vector<2x8x8xbf16>, vector<2x8x16xbf16>, vector<2x8x16xf32> -> vector<2x8x16xf32>
    "tpu.trace_stop"() : () -> ()
    %130 = vector.shape_cast %129 : vector<2x8x16xf32> to vector<16x16xf32>
    %131 = arith.truncf %130 : vector<16x16xf32> to vector<16x16xbf16>
    %132 = vector.extract_strided_slice %5 {offsets = [48, 0], sizes = [16, 32], strides = [1, 1]} : vector<128x32xbf16> to vector<16x32xbf16>
    %cst_30 = arith.constant dense<0.000000e+00> : vector<16x32xf32>
    %133 = tpu.matmul %131, %132, %cst_30 {dimension_numbers = #tpu.dot_dimension_numbers<[1], [0], [0], [1], [0, 0, 1, 1], [], []>} : vector<16x16xbf16>, vector<16x32xbf16>, vector<16x32xf32> -> vector<16x32xf32>
    %134 = arith.addf %103, %133 : vector<16x32xf32>
    %135 = vector.extract_strided_slice %4 {offsets = [0, 64], sizes = [16, 16], strides = [1, 1]} : vector<16x384xf32> to vector<16x16xf32>
    %136 = arith.truncf %135 : vector<16x16xf32> to vector<16x16xbf16>
    %137 = vector.extract_strided_slice %4 {offsets = [0, 192], sizes = [16, 16], strides = [1, 1]} : vector<16x384xf32> to vector<16x16xf32>
    %138 = arith.truncf %137 : vector<16x16xf32> to vector<16x16xbf16>
    %139 = vector.extract_strided_slice %4 {offsets = [0, 320], sizes = [16, 16], strides = [1, 1]} : vector<16x384xf32> to vector<16x16xf32>
    %140 = arith.truncf %139 : vector<16x16xf32> to vector<16x16xbf16>
    %141 = vector.shape_cast %136 : vector<16x16xbf16> to vector<2x8x16xbf16>
    %142 = vector.shape_cast %138 : vector<16x16xbf16> to vector<2x8x16xbf16>
    %143 = vector.shape_cast %140 : vector<16x16xbf16> to vector<2x8x16xbf16>
    "tpu.trace_start"() <{level = 10 : i32, message = "bqd,bkd->bqk"}> : () -> ()
    %cst_31 = arith.constant dense<0.000000e+00> : vector<2x8x8xf32>
    %144 = tpu.matmul %141, %142, %cst_31 {dimension_numbers = #tpu.dot_dimension_numbers<[2], [2], [1], [1], [0, 0, 0, 1, 1, 1], [0], [0]>} : vector<2x8x16xbf16>, vector<2x8x16xbf16>, vector<2x8x8xf32> -> vector<2x8x8xf32>
    %cst_32 = arith.constant -1.000000e+30 : f32
    "tpu.trace_stop"() : () -> ()
    %145 = vector.shape_cast %9 : vector<1x8x8xi1> to vector<1x8x8xi1>
    %146 = vector.broadcast %145 : vector<1x8x8xi1> to vector<2x8x8xi1>
    %147 = vector.broadcast %cst_32 : f32 to vector<2x8x8xf32>
    %148 = arith.select %146, %144, %147 : vector<2x8x8xi1>, vector<2x8x8xf32>
    %cst_33 = arith.constant dense<0xFF800000> : vector<2x8xf32>
    %149 = vector.multi_reduction <maximumf>, %148, %cst_33 [2] : vector<2x8x8xf32> to vector<2x8xf32>
    %150 = vector.shape_cast %149 : vector<2x8xf32> to vector<2x8x1xf32>
    %151 = vector.broadcast %150 : vector<2x8x1xf32> to vector<2x8x8xf32>
    %152 = arith.subf %148, %151 : vector<2x8x8xf32>
    %153 = math.exp %152 : vector<2x8x8xf32>
    %cst_34 = arith.constant dense<0.000000e+00> : vector<2x8xf32>
    %154 = vector.multi_reduction <add>, %153, %cst_34 [2] : vector<2x8x8xf32> to vector<2x8xf32>
    %155 = vector.shape_cast %154 : vector<2x8xf32> to vector<2x8x1xf32>
    %156 = tpu.reciprocal %155 {approx = true} : vector<2x8x1xf32> -> vector<2x8x1xf32>
    %157 = vector.broadcast %156 : vector<2x8x1xf32> to vector<2x8x8xf32>
    %158 = arith.mulf %153, %157 : vector<2x8x8xf32>
    %159 = arith.truncf %158 : vector<2x8x8xf32> to vector<2x8x8xbf16>
    "tpu.trace_start"() <{level = 10 : i32, message = "bqk,bkd->bqd"}> : () -> ()
    %cst_35 = arith.constant dense<0.000000e+00> : vector<2x8x16xf32>
    %160 = tpu.matmul %159, %143, %cst_35 {dimension_numbers = #tpu.dot_dimension_numbers<[2], [1], [1], [2], [0, 0, 0, 1, 1, 2], [0], [0]>} : vector<2x8x8xbf16>, vector<2x8x16xbf16>, vector<2x8x16xf32> -> vector<2x8x16xf32>
    "tpu.trace_stop"() : () -> ()
    %161 = vector.shape_cast %160 : vector<2x8x16xf32> to vector<16x16xf32>
    %162 = arith.truncf %161 : vector<16x16xf32> to vector<16x16xbf16>
    %163 = vector.extract_strided_slice %5 {offsets = [64, 0], sizes = [16, 32], strides = [1, 1]} : vector<128x32xbf16> to vector<16x32xbf16>
    %cst_36 = arith.constant dense<0.000000e+00> : vector<16x32xf32>
    %164 = tpu.matmul %162, %163, %cst_36 {dimension_numbers = #tpu.dot_dimension_numbers<[1], [0], [0], [1], [0, 0, 1, 1], [], []>} : vector<16x16xbf16>, vector<16x32xbf16>, vector<16x32xf32> -> vector<16x32xf32>
    %165 = arith.addf %134, %164 : vector<16x32xf32>
    %166 = vector.extract_strided_slice %4 {offsets = [0, 80], sizes = [16, 16], strides = [1, 1]} : vector<16x384xf32> to vector<16x16xf32>
    %167 = arith.truncf %166 : vector<16x16xf32> to vector<16x16xbf16>
    %168 = vector.extract_strided_slice %4 {offsets = [0, 208], sizes = [16, 16], strides = [1, 1]} : vector<16x384xf32> to vector<16x16xf32>
    %169 = arith.truncf %168 : vector<16x16xf32> to vector<16x16xbf16>
    %170 = vector.extract_strided_slice %4 {offsets = [0, 336], sizes = [16, 16], strides = [1, 1]} : vector<16x384xf32> to vector<16x16xf32>
    %171 = arith.truncf %170 : vector<16x16xf32> to vector<16x16xbf16>
    %172 = vector.shape_cast %167 : vector<16x16xbf16> to vector<2x8x16xbf16>
    %173 = vector.shape_cast %169 : vector<16x16xbf16> to vector<2x8x16xbf16>
    %174 = vector.shape_cast %171 : vector<16x16xbf16> to vector<2x8x16xbf16>
    "tpu.trace_start"() <{level = 10 : i32, message = "bqd,bkd->bqk"}> : () -> ()
    %cst_37 = arith.constant dense<0.000000e+00> : vector<2x8x8xf32>
    %175 = tpu.matmul %172, %173, %cst_37 {dimension_numbers = #tpu.dot_dimension_numbers<[2], [2], [1], [1], [0, 0, 0, 1, 1, 1], [0], [0]>} : vector<2x8x16xbf16>, vector<2x8x16xbf16>, vector<2x8x8xf32> -> vector<2x8x8xf32>
    %cst_38 = arith.constant -1.000000e+30 : f32
    "tpu.trace_stop"() : () -> ()
    %176 = vector.shape_cast %9 : vector<1x8x8xi1> to vector<1x8x8xi1>
    %177 = vector.broadcast %176 : vector<1x8x8xi1> to vector<2x8x8xi1>
    %178 = vector.broadcast %cst_38 : f32 to vector<2x8x8xf32>
    %179 = arith.select %177, %175, %178 : vector<2x8x8xi1>, vector<2x8x8xf32>
    %cst_39 = arith.constant dense<0xFF800000> : vector<2x8xf32>
    %180 = vector.multi_reduction <maximumf>, %179, %cst_39 [2] : vector<2x8x8xf32> to vector<2x8xf32>
    %181 = vector.shape_cast %180 : vector<2x8xf32> to vector<2x8x1xf32>
    %182 = vector.broadcast %181 : vector<2x8x1xf32> to vector<2x8x8xf32>
    %183 = arith.subf %179, %182 : vector<2x8x8xf32>
    %184 = math.exp %183 : vector<2x8x8xf32>
    %cst_40 = arith.constant dense<0.000000e+00> : vector<2x8xf32>
    %185 = vector.multi_reduction <add>, %184, %cst_40 [2] : vector<2x8x8xf32> to vector<2x8xf32>
    %186 = vector.shape_cast %185 : vector<2x8xf32> to vector<2x8x1xf32>
    %187 = tpu.reciprocal %186 {approx = true} : vector<2x8x1xf32> -> vector<2x8x1xf32>
    %188 = vector.broadcast %187 : vector<2x8x1xf32> to vector<2x8x8xf32>
    %189 = arith.mulf %184, %188 : vector<2x8x8xf32>
    %190 = arith.truncf %189 : vector<2x8x8xf32> to vector<2x8x8xbf16>
    "tpu.trace_start"() <{level = 10 : i32, message = "bqk,bkd->bqd"}> : () -> ()
    %cst_41 = arith.constant dense<0.000000e+00> : vector<2x8x16xf32>
    %191 = tpu.matmul %190, %174, %cst_41 {dimension_numbers = #tpu.dot_dimension_numbers<[2], [1], [1], [2], [0, 0, 0, 1, 1, 2], [0], [0]>} : vector<2x8x8xbf16>, vector<2x8x16xbf16>, vector<2x8x16xf32> -> vector<2x8x16xf32>
    "tpu.trace_stop"() : () -> ()
    %192 = vector.shape_cast %191 : vector<2x8x16xf32> to vector<16x16xf32>
    %193 = arith.truncf %192 : vector<16x16xf32> to vector<16x16xbf16>
    %194 = vector.extract_strided_slice %5 {offsets = [80, 0], sizes = [16, 32], strides = [1, 1]} : vector<128x32xbf16> to vector<16x32xbf16>
    %cst_42 = arith.constant dense<0.000000e+00> : vector<16x32xf32>
    %195 = tpu.matmul %193, %194, %cst_42 {dimension_numbers = #tpu.dot_dimension_numbers<[1], [0], [0], [1], [0, 0, 1, 1], [], []>} : vector<16x16xbf16>, vector<16x32xbf16>, vector<16x32xf32> -> vector<16x32xf32>
    %196 = arith.addf %165, %195 : vector<16x32xf32>
    %197 = vector.extract_strided_slice %4 {offsets = [0, 96], sizes = [16, 16], strides = [1, 1]} : vector<16x384xf32> to vector<16x16xf32>
    %198 = arith.truncf %197 : vector<16x16xf32> to vector<16x16xbf16>
    %199 = vector.extract_strided_slice %4 {offsets = [0, 224], sizes = [16, 16], strides = [1, 1]} : vector<16x384xf32> to vector<16x16xf32>
    %200 = arith.truncf %199 : vector<16x16xf32> to vector<16x16xbf16>
    %201 = vector.extract_strided_slice %4 {offsets = [0, 352], sizes = [16, 16], strides = [1, 1]} : vector<16x384xf32> to vector<16x16xf32>
    %202 = arith.truncf %201 : vector<16x16xf32> to vector<16x16xbf16>
    %203 = vector.shape_cast %198 : vector<16x16xbf16> to vector<2x8x16xbf16>
    %204 = vector.shape_cast %200 : vector<16x16xbf16> to vector<2x8x16xbf16>
    %205 = vector.shape_cast %202 : vector<16x16xbf16> to vector<2x8x16xbf16>
    "tpu.trace_start"() <{level = 10 : i32, message = "bqd,bkd->bqk"}> : () -> ()
    %cst_43 = arith.constant dense<0.000000e+00> : vector<2x8x8xf32>
    %206 = tpu.matmul %203, %204, %cst_43 {dimension_numbers = #tpu.dot_dimension_numbers<[2], [2], [1], [1], [0, 0, 0, 1, 1, 1], [0], [0]>} : vector<2x8x16xbf16>, vector<2x8x16xbf16>, vector<2x8x8xf32> -> vector<2x8x8xf32>
    %cst_44 = arith.constant -1.000000e+30 : f32
    "tpu.trace_stop"() : () -> ()
    %207 = vector.shape_cast %9 : vector<1x8x8xi1> to vector<1x8x8xi1>
    %208 = vector.broadcast %207 : vector<1x8x8xi1> to vector<2x8x8xi1>
    %209 = vector.broadcast %cst_44 : f32 to vector<2x8x8xf32>
    %210 = arith.select %208, %206, %209 : vector<2x8x8xi1>, vector<2x8x8xf32>
    %cst_45 = arith.constant dense<0xFF800000> : vector<2x8xf32>
    %211 = vector.multi_reduction <maximumf>, %210, %cst_45 [2] : vector<2x8x8xf32> to vector<2x8xf32>
    %212 = vector.shape_cast %211 : vector<2x8xf32> to vector<2x8x1xf32>
    %213 = vector.broadcast %212 : vector<2x8x1xf32> to vector<2x8x8xf32>
    %214 = arith.subf %210, %213 : vector<2x8x8xf32>
    %215 = math.exp %214 : vector<2x8x8xf32>
    %cst_46 = arith.constant dense<0.000000e+00> : vector<2x8xf32>
    %216 = vector.multi_reduction <add>, %215, %cst_46 [2] : vector<2x8x8xf32> to vector<2x8xf32>
    %217 = vector.shape_cast %216 : vector<2x8xf32> to vector<2x8x1xf32>
    %218 = tpu.reciprocal %217 {approx = true} : vector<2x8x1xf32> -> vector<2x8x1xf32>
    %219 = vector.broadcast %218 : vector<2x8x1xf32> to vector<2x8x8xf32>
    %220 = arith.mulf %215, %219 : vector<2x8x8xf32>
    %221 = arith.truncf %220 : vector<2x8x8xf32> to vector<2x8x8xbf16>
    "tpu.trace_start"() <{level = 10 : i32, message = "bqk,bkd->bqd"}> : () -> ()
    %cst_47 = arith.constant dense<0.000000e+00> : vector<2x8x16xf32>
    %222 = tpu.matmul %221, %205, %cst_47 {dimension_numbers = #tpu.dot_dimension_numbers<[2], [1], [1], [2], [0, 0, 0, 1, 1, 2], [0], [0]>} : vector<2x8x8xbf16>, vector<2x8x16xbf16>, vector<2x8x16xf32> -> vector<2x8x16xf32>
    "tpu.trace_stop"() : () -> ()
    %223 = vector.shape_cast %222 : vector<2x8x16xf32> to vector<16x16xf32>
    %224 = arith.truncf %223 : vector<16x16xf32> to vector<16x16xbf16>
    %225 = vector.extract_strided_slice %5 {offsets = [96, 0], sizes = [16, 32], strides = [1, 1]} : vector<128x32xbf16> to vector<16x32xbf16>
    %cst_48 = arith.constant dense<0.000000e+00> : vector<16x32xf32>
    %226 = tpu.matmul %224, %225, %cst_48 {dimension_numbers = #tpu.dot_dimension_numbers<[1], [0], [0], [1], [0, 0, 1, 1], [], []>} : vector<16x16xbf16>, vector<16x32xbf16>, vector<16x32xf32> -> vector<16x32xf32>
    %227 = arith.addf %196, %226 : vector<16x32xf32>
    %228 = vector.extract_strided_slice %4 {offsets = [0, 112], sizes = [16, 16], strides = [1, 1]} : vector<16x384xf32> to vector<16x16xf32>
    %229 = arith.truncf %228 : vector<16x16xf32> to vector<16x16xbf16>
    %230 = vector.extract_strided_slice %4 {offsets = [0, 240], sizes = [16, 16], strides = [1, 1]} : vector<16x384xf32> to vector<16x16xf32>
    %231 = arith.truncf %230 : vector<16x16xf32> to vector<16x16xbf16>
    %232 = vector.extract_strided_slice %4 {offsets = [0, 368], sizes = [16, 16], strides = [1, 1]} : vector<16x384xf32> to vector<16x16xf32>
    %233 = arith.truncf %232 : vector<16x16xf32> to vector<16x16xbf16>
    %234 = vector.shape_cast %229 : vector<16x16xbf16> to vector<2x8x16xbf16>
    %235 = vector.shape_cast %231 : vector<16x16xbf16> to vector<2x8x16xbf16>
    %236 = vector.shape_cast %233 : vector<16x16xbf16> to vector<2x8x16xbf16>
    "tpu.trace_start"() <{level = 10 : i32, message = "bqd,bkd->bqk"}> : () -> ()
    %cst_49 = arith.constant dense<0.000000e+00> : vector<2x8x8xf32>
    %237 = tpu.matmul %234, %235, %cst_49 {dimension_numbers = #tpu.dot_dimension_numbers<[2], [2], [1], [1], [0, 0, 0, 1, 1, 1], [0], [0]>} : vector<2x8x16xbf16>, vector<2x8x16xbf16>, vector<2x8x8xf32> -> vector<2x8x8xf32>
    %cst_50 = arith.constant -1.000000e+30 : f32
    "tpu.trace_stop"() : () -> ()
    %238 = vector.shape_cast %9 : vector<1x8x8xi1> to vector<1x8x8xi1>
    %239 = vector.broadcast %238 : vector<1x8x8xi1> to vector<2x8x8xi1>
    %240 = vector.broadcast %cst_50 : f32 to vector<2x8x8xf32>
    %241 = arith.select %239, %237, %240 : vector<2x8x8xi1>, vector<2x8x8xf32>
    %cst_51 = arith.constant dense<0xFF800000> : vector<2x8xf32>
    %242 = vector.multi_reduction <maximumf>, %241, %cst_51 [2] : vector<2x8x8xf32> to vector<2x8xf32>
    %243 = vector.shape_cast %242 : vector<2x8xf32> to vector<2x8x1xf32>
    %244 = vector.broadcast %243 : vector<2x8x1xf32> to vector<2x8x8xf32>
    %245 = arith.subf %241, %244 : vector<2x8x8xf32>
    %246 = math.exp %245 : vector<2x8x8xf32>
    %cst_52 = arith.constant dense<0.000000e+00> : vector<2x8xf32>
    %247 = vector.multi_reduction <add>, %246, %cst_52 [2] : vector<2x8x8xf32> to vector<2x8xf32>
    %248 = vector.shape_cast %247 : vector<2x8xf32> to vector<2x8x1xf32>
    %249 = tpu.reciprocal %248 {approx = true} : vector<2x8x1xf32> -> vector<2x8x1xf32>
    %250 = vector.broadcast %249 : vector<2x8x1xf32> to vector<2x8x8xf32>
    %251 = arith.mulf %246, %250 : vector<2x8x8xf32>
    %252 = arith.truncf %251 : vector<2x8x8xf32> to vector<2x8x8xbf16>
    "tpu.trace_start"() <{level = 10 : i32, message = "bqk,bkd->bqd"}> : () -> ()
    %cst_53 = arith.constant dense<0.000000e+00> : vector<2x8x16xf32>
    %253 = tpu.matmul %252, %236, %cst_53 {dimension_numbers = #tpu.dot_dimension_numbers<[2], [1], [1], [2], [0, 0, 0, 1, 1, 2], [0], [0]>} : vector<2x8x8xbf16>, vector<2x8x16xbf16>, vector<2x8x16xf32> -> vector<2x8x16xf32>
    "tpu.trace_stop"() : () -> ()
    %254 = vector.shape_cast %253 : vector<2x8x16xf32> to vector<16x16xf32>
    %255 = arith.truncf %254 : vector<16x16xf32> to vector<16x16xbf16>
    %256 = vector.extract_strided_slice %5 {offsets = [112, 0], sizes = [16, 32], strides = [1, 1]} : vector<128x32xbf16> to vector<16x32xbf16>
    %cst_54 = arith.constant dense<0.000000e+00> : vector<16x32xf32>
    %257 = tpu.matmul %255, %256, %cst_54 {dimension_numbers = #tpu.dot_dimension_numbers<[1], [0], [0], [1], [0, 0, 1, 1], [], []>} : vector<16x16xbf16>, vector<16x32xbf16>, vector<16x32xf32> -> vector<16x32xf32>
    %258 = arith.addf %227, %257 : vector<16x32xf32>
    %c0_55 = arith.constant 0 : index
    %c0_56 = arith.constant 0 : index
    %259 = vector.load %arg4[%c0_55, %c0_56] : memref<1x32xf32, #tpu.memory_space<vmem>>, vector<1x32xf32>
    %260 = vector.broadcast %259 : vector<1x32xf32> to vector<16x32xf32>
    %261 = arith.addf %258, %260 : vector<16x32xf32>
    %262 = vector.shape_cast %261 : vector<16x32xf32> to vector<2x8x32xf32>
    %263 = vector.extract_strided_slice %262 {offsets = [0, 0, 0], sizes = [2, 1, 32], strides = [1, 1, 1]} : vector<2x8x32xf32> to vector<2x1x32xf32>
    %264 = vector.shape_cast %263 : vector<2x1x32xf32> to vector<2x32xf32>
    %265 = vector.extract_strided_slice %262 {offsets = [0, 1, 0], sizes = [2, 1, 32], strides = [1, 1, 1]} : vector<2x8x32xf32> to vector<2x1x32xf32>
    %266 = vector.shape_cast %265 : vector<2x1x32xf32> to vector<2x32xf32>
    %267 = vector.extract_strided_slice %262 {offsets = [0, 2, 0], sizes = [2, 1, 32], strides = [1, 1, 1]} : vector<2x8x32xf32> to vector<2x1x32xf32>
    %268 = vector.shape_cast %267 : vector<2x1x32xf32> to vector<2x32xf32>
    %269 = vector.extract_strided_slice %262 {offsets = [0, 3, 0], sizes = [2, 1, 32], strides = [1, 1, 1]} : vector<2x8x32xf32> to vector<2x1x32xf32>
    %270 = vector.shape_cast %269 : vector<2x1x32xf32> to vector<2x32xf32>
    %271 = vector.extract_strided_slice %262 {offsets = [0, 4, 0], sizes = [2, 1, 32], strides = [1, 1, 1]} : vector<2x8x32xf32> to vector<2x1x32xf32>
    %272 = vector.shape_cast %271 : vector<2x1x32xf32> to vector<2x32xf32>
    %273 = vector.extract_strided_slice %262 {offsets = [0, 5, 0], sizes = [2, 1, 32], strides = [1, 1, 1]} : vector<2x8x32xf32> to vector<2x1x32xf32>
    %274 = vector.shape_cast %273 : vector<2x1x32xf32> to vector<2x32xf32>
    %275 = vector.extract_strided_slice %262 {offsets = [0, 6, 0], sizes = [2, 1, 32], strides = [1, 1, 1]} : vector<2x8x32xf32> to vector<2x1x32xf32>
    %276 = vector.shape_cast %275 : vector<2x1x32xf32> to vector<2x32xf32>
    %277 = vector.extract_strided_slice %262 {offsets = [0, 7, 0], sizes = [2, 1, 32], strides = [1, 1, 1]} : vector<2x8x32xf32> to vector<2x1x32xf32>
    %278 = vector.shape_cast %277 : vector<2x1x32xf32> to vector<2x32xf32>
    %279 = tpu.concatenate %264, %266, %268, %270, %272, %274, %276, %278 in 1 : vector<2x32xf32>, vector<2x32xf32>, vector<2x32xf32>, vector<2x32xf32>, vector<2x32xf32>, vector<2x32xf32>, vector<2x32xf32>, vector<2x32xf32> -> vector<2x256xf32>
    %280 = vector.shape_cast %279 : vector<2x256xf32> to vector<2x1x256xf32>
    %c0_57 = arith.constant 0 : index
    %c0_58 = arith.constant 0 : index
    %c0_59 = arith.constant 0 : index
    %281 = vector.load %arg5[%c0_57, %c0_58, %c0_59] : memref<2x1x256xf32, #tpu.memory_space<vmem>>, vector<2x1x256xf32>
    tpu.vector_store %arg5[%c0_57, %c0_58, %c0_59], %280 {strides = array<i32>} : memref<2x1x256xf32, #tpu.memory_space<vmem>>, vector<2x1x256xf32>,
    return
  }
  func.func @transform_0(%arg0: i32) -> (i32, i32, i32) {
    %c0_i32 = arith.constant 0 : i32
    %c0_i32_0 = arith.constant 0 : i32
    %c0_i32_1 = arith.constant 0 : i32
    return %arg0, %c0_i32, %c0_i32_0 : i32, i32, i32
  }
  func.func @transform_1(%arg0: i32) -> (i32, i32) {
    %c0_i32 = arith.constant 0 : i32
    %c0_i32_0 = arith.constant 0 : i32
    %c0_i32_1 = arith.constant 0 : i32
    return %c0_i32, %c0_i32_0 : i32, i32
  }
  func.func @transform_2(%arg0: i32) -> (i32, i32) {
    %c0_i32 = arith.constant 0 : i32
    %c0_i32_0 = arith.constant 0 : i32
    %c0_i32_1 = arith.constant 0 : i32
    return %c0_i32, %c0_i32_0 : i32, i32
  }
  func.func @transform_3(%arg0: i32) -> (i32, i32) {
    %c0_i32 = arith.constant 0 : i32
    %c0_i32_0 = arith.constant 0 : i32
    %c0_i32_1 = arith.constant 0 : i32
    return %c0_i32, %c0_i32_0 : i32, i32
  }
  func.func @transform_4(%arg0: i32) -> (i32, i32, i32) {
    %c0_i32 = arith.constant 0 : i32
    %c0_i32_0 = arith.constant 0 : i32
    %c0_i32_1 = arith.constant 0 : i32
    return %arg0, %c0_i32, %c0_i32_0 : i32, i32, i32
  }
}

</mosaic_0001>

<bundles_post_ra>
// kernel: tpu_custom_call.1
= control target key start
LH: loop header
LB: loop body
LE: loop exit
PB: predicated region body
PF: predicated region fallthrough
CT: control target
= control target key end

     0   :  { %v3004_v2 = vmov 0   ;;  %v3005_v6 = vmov 0.0   ;;  %vm62_vm0 = vcmask 261120   ;;  %s3534_s0 = inlined_call_operand.vmem [shape: f32[2,8,32], index: 0, kind: input, shape index: {}]   ;;  %s3535_s1 = inlined_call_operand.vmem [shape: bf16[32,384], index: 1, kind: input, shape index: {}]   ;;  %s3536_s2 = inlined_call_operand.vmem [shape: bf16[128,32], index: 2, kind: input, shape index: {}]   ;;  %s3537_s3 = inlined_call_operand.vmem [shape: f32[1,32], index: 3, kind: input, shape index: {}]   ;;  %s3538_s4 = inlined_call_operand.hbm [shape: f32[2,1,256], index: 4, kind: output, shape index: {}]  }
   0x1   :  { %v2902_v0 = vld [vmem:[%s3535_s1 + $0x1c] ss:$12 sps:$4 sm:$0xff]   ;;  %v2904_v1 = vld [vmem:[%s3535_s1 + $0x18] ss:$12 sps:$4 sm:$0xff]   ;;  %98 = vmatprep.mubr.bf16.mxu0 %v3004_v2  ;;  %v2907_v4 = vld [vmem:[%s3535_s1] ss:$12 sps:$4 sm:$0xff]   ;;  %2641 = vmatprep.subr.bf16.mxu1 %v3005_v6 }
   0x2   :  { %78 = vmatprep.subr.bf16.mxu0 %v2902_v0  ;;  %v2905_v3 = vld [vmem:[%s3535_s1 + $0x4] ss:$12 sps:$4 sm:$0xff]   ;;  %v20_v7 = vld [vmem:[%s3534_s0 + $0x8] sm:$0xff] }
   0x3   :  { %v19_v5 = vld [vmem:[%s3534_s0] sm:$0xff]  ;;  %79 = vmatpush1.bf16.msra.mxu0 %v2904_v1 }
   0x4   :  { %80 = vmatprep.subr.bf16.mxu0 %v2905_v3  ;;  %v2908_v8 = vld [vmem:[%s3535_s1 + $0x20] ss:$12 sps:$4 sm:$0xff]   ;;  %v21_v9 = vpack.c.bf16 %v20_v7, %v19_v5 }
   0x5   :  { %2642 = vmatpush3.bf16.msra.mxu1 %v2908_v8 }
   0x6   :  { %2643 = vmatprep.subr.bf16.mxu1 %v3005_v6 }
   0x7   :  { %81 = vmatpush1.bf16.msra.mxu0 %v2907_v4 }
   0x8   :  { %2649 = vmatprep.subr.bf16.mxu0 %v3005_v6 }
   0xa   :  { %2495 = vmatmul.mubr.msk.bf16.vlgmr.msra.gmra.mxu0 %vm62_vm0, %v21_v9 }
   0xb   :  { %9 = vsyncpa [#allocation3], 0  ;;  %v2909_v10 = vld [vmem:[%s3535_s1 + $0x8] ss:$12 sps:$4 sm:$0xff]   ;;  %vm3006_vm1 = vmmov 0   ;;  %vm189_vm2 = vcmask 130048   ;;  %v166_v29 = vlaneseq }
   0xc   :  { %2644 = vmatpush3.bf16.msra.mxu1 %v2909_v10  ;;  %2645 = vmatprep.mubr.msk.bf16.mxu1 %vm3006_vm1, %v3005_v6  ;;  %s3007_s0 = smov 112   ;;  %vm314_vm3 = vcmask 1043456   ;;  %vm286_vm5 = vcmask 64512   ;;  %s3008_s1 = smov 96   ;;  %vm2390_vm6 = vcmask 1041409   ;;  %vm2433_vm7 = vcmask 523264  }
   0xd   :  { %2655 = vmatprep.subr.bf16.mxu1 %v3005_v6  ;;  %2651 = vmatprep.mubr.msk.bf16.mxu0 %vm3006_vm1, %v3005_v6  ;;  %v3113_v30 = vshrl.u32 %v166_v29, 7  ;;  %v169_v31 = vand.u32 127, %v166_v29  ;;  %s3009_s9 = smov 80   ;;  %s3010_s12 = smov 64   ;;  %vm2435_vm8 = vcmask 785408   ;;  %vm2469_vm9 = vcmp.lt.s32.totalorder %v166_v29, 256 }
   0xe   :  { %s3011_s15 = smov 48   ;;  %s3012_s18 = smov 32  }
   0xf   :  { %2646 = vmatmul.mubr.msk.bf16.vlgmr.msra.gmra.mxu1 %vm62_vm0, %v21_v9  ;;  %vm3117_vm4 = vcmp.ge.s32.totalorder %v3113_v30, %v169_v31  ;;  %s3013_s21 = smov 16  }
  0x10   :  { %2657 = vmatprep.mubr.msk.bf16.mxu1 %vm3006_vm1, %v3005_v6 }
  0xca   :  { %v100_v11 = vpop.f32.mrf.mxu0 }
  0xcb   :  { %v3089_v19 = vpack.c.bf16 %v100_v11, %v100_v11 }
  0xcc   :  { %v102_v12 = vpop.f32.mrf.mxu0 }
  0xcd   :  { %v3078_v13 = vpack.c.bf16 %v102_v12, %v102_v12 }
  0xce   :  { %v104_v14 = vpop.f32.mrf.mxu0 }
  0xcf   :  { %v194_v15 = vsel %vm189_vm2, %v3078_v13, 0  ;;  %v3096_v20 = vpack.c.bf16 %v104_v14, %v104_v14  ;;  %v143_v21 = vpop.f32.mrf.mxu1 }
  0xd0   :  { %v106_v16 = vpop.f32.mrf.mxu0  ;;  %2650 = vmatpush3.bf16.xpose.msra.mxu0 %v194_v15  ;;  %v3102_v24 = vpack.c.bf16 %v143_v21, %v143_v21 }
  0xd1   :  { %v3082_v17 = vpack.c.bf16 %v106_v16, %v106_v16  ;;  %2661 = vmatprep.subr.bf16.mxu0 %v3005_v6  ;;  %v2647_v22 = vpop.f32.mrf.mxu1 }
  0xd2   :  { %v316_v27 = vsel %vm314_vm3, %v3102_v24, 0 }
  0xd3   :  { %457 = vrot.lane.b32.xlu1 %v3082_v17, %s3007_s0  ;;  %v240_v18 = vsel %vm189_vm2, %v3082_v17, 0  ;;  %v146_v23 = vpop.f32.mrf.mxu1 }
  0xd4   :  { %2656 = vmatpush3.bf16.xpose.msra.mxu1 %v240_v18  ;;  %v3104_v25 = vpack.c.bf16 %v146_v23, %v146_v23 }
  0xd5   :  { %2667 = vmatprep.subr.bf16.mxu1 %v3005_v6  ;;  %v2648_v26 = vpop.f32.mrf.mxu1 }
  0xd6   :  { %v362_v28 = vsel %vm314_vm3, %v3104_v25, 0 }
  0xd7   :  { %2652 = vmatmul.mubr.msk.bf16.vlgmr.msra.gmra.mxu0 %vm189_vm2, %v3089_v19 }
  0xd8   :  { %2663 = vmatprep.mubr.msk.bf16.mxu0 %vm3006_vm1, %v3005_v6  ;;  %2662 = vmatpush3.bf16.msra.mxu0 %v316_v27 }
  0xd9   :  { %2673 = vmatprep.subr.bf16.mxu0 %v3005_v6 }
  0xdb   :  { %2658 = vmatmul.mubr.msk.bf16.vlgmr.msra.gmra.mxu1 %vm189_vm2, %v3096_v20 }
  0xdc   :  { %2669 = vmatprep.mubr.msk.bf16.mxu1 %vm3006_vm1, %v3005_v6  ;;  %2668 = vmatpush3.bf16.msra.mxu1 %v362_v28 }
  0xdd   :  { %2679 = vmatprep.subr.bf16.mxu1 %v3005_v6 }
 0x145   :  { %v458_v55 = vpop.permute.xlu1 %457 }
 0x146   :  { %v463_v2 = vsel %vm189_vm2, %v458_v55, 0 }
 0x197   :  { %v230_v33 = vpop.f32.mrf.mxu0 }
 0x198   :  { %v284_v34 = vsel %vm3117_vm4, %v230_v33, -1e+30 }
 0x199   :  { %v2653_v35 = vpop.f32.mrf.mxu0  ;;  %v287_v36 = vsel %vm286_vm5, %v284_v34, -inf }
 0x19a   :  { %288 = vmax.xlane.f32.xlu0 %v287_v36 }
 0x19b   :  { %v233_v37 = vpop.f32.mrf.mxu0  ;;  %v276_v38 = vpop.f32.mrf.mxu1 }
 0x19c   :  { %v285_v39 = vsel %vm3117_vm4, %v276_v38, -1e+30 }
 0x19d   :  { %v2654_v40 = vpop.f32.mrf.mxu0  ;;  %v2659_v41 = vpop.f32.mrf.mxu1  ;;  %v290_v42 = vsel %vm286_vm5, %v285_v39, -inf }
 0x19e   :  { %291 = vmax.xlane.f32.xlu0 %v290_v42 }
 0x19f   :  { %v279_v43 = vpop.f32.mrf.mxu1 }
 0x1a1   :  { %v2660_v44 = vpop.f32.mrf.mxu1 }
 0x1b4   :  { %407 = vrot.lane.b32.xlu0 %v3078_v13, %s3007_s0 }
 0x223   :  { %v289_v45 = vpop.xlane.xlu0 %288 }
 0x224   :  { %v293_v46 = vsub.f32 %v284_v34, %v289_v45 }
 0x226   :  { %v295_v47 = vmul.f32 1.442695, %v293_v46 }
 0x227   :  { %v292_v48 = vpop.xlane.xlu0 %291 }
 0x228   :  { %2918 = vpow2.f32 %v295_v47  ;;  %v294_v49 = vsub.f32 %v285_v39, %v292_v48 }
 0x22a   :  { %v297_v50 = vmul.f32 1.442695, %v294_v49 }
 0x22b   :  { %v408_v60 = vpop.permute.xlu0 %407 }
 0x22c   :  { %2920 = vpow2.f32 %v297_v50  ;;  %v413_v63 = vsel %vm189_vm2, %v408_v60, 0 }
 0x235   :  { %v2919_v51 = vpop.eup %2918 }
 0x236   :  { %v299_v52 = vsel %vm286_vm5, %v2919_v51, 0.0 }
 0x237   :  { %300 = vadd.xlane.f32.xlu1 %v299_v52 }
 0x239   :  { %v2921_v53 = vpop.eup %2920 }
 0x23a   :  { %v302_v54 = vsel %vm286_vm5, %v2921_v53, 0.0 }
 0x23b   :  { %303 = vadd.xlane.f32.xlu1 %v302_v54 }
 0x24c   :  { %405 = vrot.lane.b32.xlu1 %v3089_v19, %s3007_s0 }
 0x250   :  { %455 = vrot.lane.b32.xlu1 %v3096_v20, %s3007_s0 }
 0x2c0   :  { %v301_v56 = vpop.xlane.xlu1 %300 }
 0x2c1   :  { %2922 = vrcp.f32 %v301_v56 }
 0x2c4   :  { %v304_v57 = vpop.xlane.xlu1 %303 }
 0x2c5   :  { %2924 = vrcp.f32 %v304_v57  ;;  %v2910_v57 = vld [vmem:[%s3536_s2] sm:$0xff]  }
 0x2c8   :  { %v406_v3 = vpop.permute.xlu1 %405 }
 0x2cc   :  { %v456_v4 = vpop.permute.xlu1 %455 }
 0x2ce   :  { %v2923_v58 = vpop.eup %2922 }
 0x2cf   :  { %v307_v59 = vmul.f32 %v2923_v58, %v2919_v51 }
 0x2d1   :  { %v309_v61 = vpack.c.bf16 %v307_v59, %v307_v59 }
 0x2d2   :  { %v2925_v62 = vpop.eup %2924 }
 0x2d3   :  { %2664 = vmatmul.mubr.msk.bf16.vlgmr.msra.gmra.mxu0 %vm286_vm5, %v309_v61  ;;  %v308_v0 = vmul.f32 %v2925_v62, %v2921_v53 }
 0x2d4   :  { %2674 = vmatpush3.bf16.xpose.msra.mxu0 %v413_v63  ;;  %2675 = vmatprep.mubr.msk.bf16.mxu0 %vm3006_vm1, %v3005_v6  ;;  %v2911_v63 = vld [vmem:[%s3536_s2 + $0x8] sm:$0xff]  }
 0x2d5   :  { %v310_v1 = vpack.c.bf16 %v308_v0, %v308_v0  ;;  %2685 = vmatprep.subr.bf16.mxu0 %v3005_v6 }
 0x2d7   :  { %2670 = vmatmul.mubr.msk.bf16.vlgmr.msra.gmra.mxu1 %vm286_vm5, %v310_v1 }
 0x2d8   :  { %2680 = vmatpush3.bf16.xpose.msra.mxu1 %v463_v2  ;;  %2681 = vmatprep.mubr.msk.bf16.mxu1 %vm3006_vm1, %v3005_v6 }
 0x2d9   :  { %2691 = vmatprep.subr.bf16.mxu1 %v3005_v6 }
 0x2db   :  { %2676 = vmatmul.mubr.msk.bf16.vlgmr.msra.gmra.mxu0 %vm189_vm2, %v406_v3 }
 0x2dc   :  { %2687 = vmatprep.mubr.msk.bf16.mxu0 %vm3006_vm1, %v3005_v6 }
 0x2df   :  { %2682 = vmatmul.mubr.msk.bf16.vlgmr.msra.gmra.mxu1 %vm189_vm2, %v456_v4 }
 0x2e0   :  { %2693 = vmatprep.mubr.msk.bf16.mxu1 %vm3006_vm1, %v3005_v6 }
 0x393   :  { %v3151_v5 = vpop.f32.mrf.mxu0 }
 0x395   :  { %v2665_v7 = vpop.f32.mrf.mxu0 }
 0x397   :  { %v355_v8 = vpop.f32.mrf.mxu0  ;;  %v3153_v9 = vpop.f32.mrf.mxu1 }
 0x398   :  { %v404_v10 = vpack.c.bf16 %v3153_v9, %v3151_v5 }
 0x399   :  { %v2666_v11 = vpop.f32.mrf.mxu0  ;;  %v2671_v12 = vpop.f32.mrf.mxu1 }
 0x39b   :  { %v401_v14 = vpop.f32.mrf.mxu1  ;;  %v449_v15 = vpop.f32.mrf.mxu0 }
 0x39c   :  { %v505_v16 = vsel %vm3117_vm4, %v449_v15, -1e+30 }
 0x39d   :  { %v2672_v18 = vpop.f32.mrf.mxu1  ;;  %v2677_v21 = vpop.f32.mrf.mxu0  ;;  %v507_v22 = vsel %vm286_vm5, %v505_v16, -inf }
 0x39e   :  { %508 = vmax.xlane.f32.xlu0 %v507_v22 }
 0x39f   :  { %v452_v23 = vpop.f32.mrf.mxu0  ;;  %v499_v26 = vpop.f32.mrf.mxu1 }
 0x3a0   :  { %v506_v27 = vsel %vm3117_vm4, %v499_v26, -1e+30 }
 0x3a1   :  { %v2678_v28 = vpop.f32.mrf.mxu0  ;;  %v2683_v31 = vpop.f32.mrf.mxu1  ;;  %v510_v33 = vsel %vm286_vm5, %v506_v27, -inf }
 0x3a2   :  { %511 = vmax.xlane.f32.xlu1 %v510_v33 }
 0x3a3   :  { %v502_v34 = vpop.f32.mrf.mxu1 }
 0x3a5   :  { %v2684_v35 = vpop.f32.mrf.mxu1 }
 0x3b3   :  { %579 = vrot.lane.b32.xlu1 %v3104_v25, %s3007_s0 }
 0x3b7   :  { %730 = vrot.lane.b32.xlu1 %v3078_v13, %s3008_s1 }
 0x3bb   :  { %780 = vrot.lane.b32.xlu1 %v3082_v17, %s3008_s1 }
 0x3bf   :  { %778 = vrot.lane.b32.xlu1 %v3096_v20, %s3008_s1 }
 0x427   :  { %v509_v36 = vpop.xlane.xlu0 %508 }
 0x428   :  { %v513_v37 = vsub.f32 %v505_v16, %v509_v36 }
 0x42a   :  { %v515_v38 = vmul.f32 1.442695, %v513_v37 }
 0x42b   :  { %v512_v39 = vpop.xlane.xlu1 %511 }
 0x42c   :  { %2926 = vpow2.f32 %v515_v38  ;;  %v514_v40 = vsub.f32 %v506_v27, %v512_v39 }
 0x42e   :  { %v517_v41 = vmul.f32 1.442695, %v514_v40 }
 0x42f   :  { %v580_v42 = vpop.permute.xlu1 %579 }
 0x430   :  { %2928 = vpow2.f32 %v517_v41  ;;  %v585_v43 = vsel %vm314_vm3, %v580_v42, 0 }
 0x431   :  { %2692 = vmatpush3.bf16.msra.mxu1 %v585_v43 }
 0x432   :  { %2703 = vmatprep.subr.bf16.mxu1 %v3005_v6 }
 0x433   :  { %v731_v59 = vpop.permute.xlu1 %730 }
 0x434   :  { %v736_v8 = vsel %vm189_vm2, %v731_v59, 0 }
 0x437   :  { %v781_v60 = vpop.permute.xlu1 %780 }
 0x438   :  { %v786_v61 = vsel %vm189_vm2, %v781_v60, 0 }
 0x439   :  { %v2927_v44 = vpop.eup %2926 }
 0x43a   :  { %v519_v45 = vsel %vm286_vm5, %v2927_v44, 0.0 }
 0x43b   :  { %520 = vadd.xlane.f32.xlu0 %v519_v45  ;;  %v779_v62 = vpop.permute.xlu1 %778 }
 0x43d   :  { %v2929_v46 = vpop.eup %2928 }
 0x43e   :  { %v522_v47 = vsel %vm286_vm5, %v2929_v46, 0.0 }
 0x43f   :  { %523 = vadd.xlane.f32.xlu0 %v522_v47 }
 0x455   :  { %531 = vrot.lane.b32.xlu0 %v3102_v24, %s3007_s0 }
 0x459   :  { %728 = vrot.lane.b32.xlu0 %v3089_v19, %s3008_s1 }
 0x4c4   :  { %v521_v48 = vpop.xlane.xlu0 %520 }
 0x4c5   :  { %2930 = vrcp.f32 %v521_v48 }
 0x4c8   :  { %v524_v49 = vpop.xlane.xlu0 %523 }
 0x4c9   :  { %2932 = vrcp.f32 %v524_v49 }
 0x4cc   :  { %v532_v50 = vpop.permute.xlu0 %531 }
 0x4cd   :  { %v537_v51 = vsel %vm314_vm3, %v532_v50, 0 }
 0x4ce   :  { %2686 = vmatpush3.bf16.msra.mxu0 %v537_v51 }
 0x4cf   :  { %2697 = vmatprep.subr.bf16.mxu0 %v3005_v6 }
 0x4d0   :  { %v729_v12 = vpop.permute.xlu0 %728 }
 0x4d2   :  { %v2931_v52 = vpop.eup %2930 }
 0x4d3   :  { %v527_v53 = vmul.f32 %v2931_v52, %v2927_v44 }
 0x4d5   :  { %v529_v54 = vpack.c.bf16 %v527_v53, %v527_v53 }
 0x4d6   :  { %v2933_v55 = vpop.eup %2932 }
 0x4d7   :  { %2688 = vmatmul.mubr.msk.bf16.vlgmr.msra.gmra.mxu0 %vm286_vm5, %v529_v54  ;;  %v528_v56 = vmul.f32 %v2933_v55, %v2929_v46 }
 0x4d8   :  { %2699 = vmatprep.mubr.msk.bf16.mxu0 %vm3006_vm1, %v3005_v6  ;;  %2698 = vmatpush3.bf16.msra.mxu0 %v2911_v63 }
 0x4d9   :  { %v530_v58 = vpack.c.bf16 %v528_v56, %v528_v56  ;;  %2709 = vmatprep.subr.bf16.mxu0 %v3005_v6 }
 0x4db   :  { %2694 = vmatmul.mubr.msk.bf16.vlgmr.msra.gmra.mxu1 %vm286_vm5, %v530_v58 }
 0x4dc   :  { %2704 = vmatpush3.bf16.msra.mxu1 %v2910_v57  ;;  %2705 = vmatprep.mubr.msk.bf16.mxu1 %vm3006_vm1, %v3005_v6 }
 0x4dd   :  { %2715 = vmatprep.subr.bf16.mxu1 %v3005_v6 }
 0x4e3   :  { %2706 = vmatmul.mubr.msk.bf16.vlgmr.msra.gmra.mxu1 %vm189_vm2, %v404_v10 }
 0x4e4   :  { %2716 = vmatpush3.bf16.xpose.msra.mxu1 %v786_v61  ;;  %2717 = vmatprep.mubr.msk.bf16.mxu1 %vm3006_vm1, %v3005_v6 }
 0x4e5   :  { %2727 = vmatprep.subr.bf16.mxu1 %v3005_v6 }
 0x4eb   :  { %2718 = vmatmul.mubr.msk.bf16.vlgmr.msra.gmra.mxu1 %vm189_vm2, %v779_v62 }
 0x4ec   :  { %2729 = vmatprep.mubr.msk.bf16.mxu1 %vm3006_vm1, %v3005_v6 }
 0x597   :  { %v573_v0 = vpop.f32.mrf.mxu0 }
 0x599   :  { %v2689_v1 = vpop.f32.mrf.mxu0 }
 0x59b   :  { %v576_v2 = vpop.f32.mrf.mxu0  ;;  %v621_v3 = vpop.f32.mrf.mxu1 }
 0x59c   :  { %v627_v4 = vpack.c.bf16 %v621_v3, %v573_v0 }
 0x59d   :  { %v2690_v5 = vpop.f32.mrf.mxu0  ;;  %v2695_v7 = vpop.f32.mrf.mxu1 }
 0x59e   :  { %2700 = vmatmul.mubr.msk.bf16.vlgmr.msra.gmra.mxu0 %vm189_vm2, %v627_v4  ;;  %v2912_v7 = vld [vmem:[%s3536_s2 + $0x10] sm:$0xff]  }
 0x59f   :  { %2710 = vmatpush3.bf16.xpose.msra.mxu0 %v736_v8  ;;  %v624_v9 = vpop.f32.mrf.mxu1  ;;  %2711 = vmatprep.mubr.msk.bf16.mxu0 %vm3006_vm1, %v3005_v6 }
 0x5a0   :  { %2721 = vmatprep.subr.bf16.mxu0 %v3005_v6 }
 0x5a1   :  { %v2696_v10 = vpop.f32.mrf.mxu1 }
 0x5a3   :  { %v3211_v11 = vpop.f32.mrf.mxu1 }
 0x5a5   :  { %v2707_v14 = vpop.f32.mrf.mxu1 }
 0x5a6   :  { %2712 = vmatmul.mubr.msk.bf16.vlgmr.msra.gmra.mxu0 %vm189_vm2, %v729_v12 }
 0x5a7   :  { %v3214_v15 = vpop.f32.mrf.mxu1  ;;  %2723 = vmatprep.mubr.msk.bf16.mxu0 %vm3006_vm1, %v3005_v6 }
 0x5a9   :  { %v2708_v16 = vpop.f32.mrf.mxu1 }
 0x5ab   :  { %v822_v18 = vpop.f32.mrf.mxu1 }
 0x5ac   :  { %v829_v21 = vsel %vm3117_vm4, %v822_v18, -1e+30 }
 0x5ad   :  { %v2719_v22 = vpop.f32.mrf.mxu1  ;;  %v833_v23 = vsel %vm286_vm5, %v829_v21, -inf }
 0x5ae   :  { %834 = vmax.xlane.f32.xlu1 %v833_v23 }
 0x5af   :  { %v825_v26 = vpop.f32.mrf.mxu1 }
 0x5b1   :  { %v2720_v27 = vpop.f32.mrf.mxu1 }
 0x5bf   :  { %902 = vrot.lane.b32.xlu1 %v3104_v25, %s3008_s1 }
 0x5c3   :  { %1005 = vrot.lane.b32.xlu1 %v3078_v13, %s3009_s9 }
 0x5c7   :  { %1055 = vrot.lane.b32.xlu1 %v3082_v17, %s3009_s9 }
 0x5cb   :  { %1053 = vrot.lane.b32.xlu1 %v3096_v20, %s3009_s9 }
 0x637   :  { %v835_v28 = vpop.xlane.xlu1 %834 }
 0x638   :  { %v837_v34 = vsub.f32 %v829_v21, %v835_v28 }
 0x63a   :  { %v840_v35 = vmul.f32 1.442695, %v837_v34 }
 0x63b   :  { %v903_v31 = vpop.permute.xlu1 %902 }
 0x63c   :  { %v908_v33 = vsel %vm314_vm3, %v903_v31, 0  ;;  %2934 = vpow2.f32 %v840_v35 }
 0x63d   :  { %2728 = vmatpush3.bf16.msra.mxu1 %v908_v33 }
 0x63e   :  { %2739 = vmatprep.subr.bf16.mxu1 %v3005_v6 }
 0x63f   :  { %v1006_v56 = vpop.permute.xlu1 %1005 }
 0x640   :  { %v1011_v58 = vsel %vm189_vm2, %v1006_v56, 0 }
 0x643   :  { %v1056_v18 = vpop.permute.xlu1 %1055 }
 0x644   :  { %v1061_v26 = vsel %vm189_vm2, %v1056_v18, 0 }
 0x647   :  { %v1054_v31 = vpop.permute.xlu1 %1053 }
 0x649   :  { %v2935_v44 = vpop.eup %2934 }
 0x64a   :  { %v845_v47 = vsel %vm286_vm5, %v2935_v44, 0.0 }
 0x65e   :  { %v3231_v36 = vpop.f32.mrf.mxu0 }
 0x660   :  { %v2701_v37 = vpop.f32.mrf.mxu0 }
 0x662   :  { %v3233_v38 = vpop.f32.mrf.mxu0 }
 0x664   :  { %v2702_v39 = vpop.f32.mrf.mxu0 }
 0x666   :  { %v772_v40 = vpop.f32.mrf.mxu0 }
 0x667   :  { %v828_v41 = vsel %vm3117_vm4, %v772_v40, -1e+30  ;;  %v722_v40 = vadd.f32 %v3211_v11, %v3231_v36 }
 0x668   :  { %v2713_v42 = vpop.f32.mrf.mxu0  ;;  %v830_v43 = vsel %vm286_vm5, %v828_v41, -inf }
 0x669   :  { %831 = vmax.xlane.f32.xlu0 %v830_v43 }
 0x66a   :  { %v775_v45 = vpop.f32.mrf.mxu0 }
 0x66c   :  { %v2714_v46 = vpop.f32.mrf.mxu0 }
 0x66d   :  { %846 = vadd.xlane.f32.xlu0 %v845_v47 }
 0x6f2   :  { %v832_v48 = vpop.xlane.xlu0 %831 }
 0x6f3   :  { %v836_v49 = vsub.f32 %v828_v41, %v832_v48 }
 0x6f5   :  { %v838_v50 = vmul.f32 1.442695, %v836_v49 }
 0x6f6   :  { %v847_v51 = vpop.xlane.xlu0 %846 }
 0x6f7   :  { %2936 = vpow2.f32 %v838_v50 }
 0x6f8   :  { %2938 = vrcp.f32 %v847_v51 }
 0x704   :  { %v2937_v52 = vpop.eup %2936 }
 0x705   :  { %v2939_v53 = vpop.eup %2938  ;;  %v842_v54 = vsel %vm286_vm5, %v2937_v52, 0.0 }
 0x706   :  { %843 = vadd.xlane.f32.xlu0 %v842_v54  ;;  %v851_v55 = vmul.f32 %v2939_v53, %v2935_v44  ;;  %v725_v44 = vadd.f32 %v3214_v15, %v3233_v38 }
 0x708   :  { %v853_v57 = vpack.c.bf16 %v851_v55, %v851_v55 }
 0x70a   :  { %2730 = vmatmul.mubr.msk.bf16.vlgmr.msra.gmra.mxu1 %vm286_vm5, %v853_v57 }
 0x70b   :  { %2740 = vmatpush3.bf16.xpose.msra.mxu1 %v1011_v58  ;;  %2741 = vmatprep.mubr.msk.bf16.mxu1 %vm3006_vm1, %v3005_v6 }
 0x70c   :  { %2751 = vmatprep.subr.bf16.mxu1 %v3005_v6 }
 0x71c   :  { %854 = vrot.lane.b32.xlu0 %v3102_v24, %s3008_s1 }
 0x720   :  { %1003 = vrot.lane.b32.xlu0 %v3089_v19, %s3009_s9 }
 0x78f   :  { %v844_v59 = vpop.xlane.xlu0 %843 }
 0x790   :  { %2940 = vrcp.f32 %v844_v59 }
 0x793   :  { %v855_v60 = vpop.permute.xlu0 %854 }
 0x794   :  { %v860_v61 = vsel %vm314_vm3, %v855_v60, 0 }
 0x795   :  { %2722 = vmatpush3.bf16.msra.mxu0 %v860_v61 }
 0x796   :  { %2733 = vmatprep.subr.bf16.mxu0 %v3005_v6 }
 0x797   :  { %v1004_v62 = vpop.permute.xlu0 %1003 }
 0x798   :  { %2742 = vmatmul.mubr.msk.bf16.vlgmr.msra.gmra.mxu1 %vm189_vm2, %v1004_v62 }
 0x799   :  { %2753 = vmatprep.mubr.msk.bf16.mxu1 %vm3006_vm1, %v3005_v6 }
 0x79d   :  { %v2941_v63 = vpop.eup %2940 }
 0x79e   :  { %v850_v0 = vmul.f32 %v2941_v63, %v2937_v52 }
 0x7a0   :  { %v852_v1 = vpack.c.bf16 %v850_v0, %v850_v0 }
 0x7a2   :  { %2724 = vmatmul.mubr.msk.bf16.vlgmr.msra.gmra.mxu0 %vm286_vm5, %v852_v1 }
 0x7a3   :  { %2735 = vmatprep.mubr.msk.bf16.mxu0 %vm3006_vm1, %v3005_v6  ;;  %2734 = vmatpush3.bf16.msra.mxu0 %v2912_v7  ;;  %v2913_v7 = vld [vmem:[%s3536_s2 + $0x18] sm:$0xff]  }
 0x7a4   :  { %2745 = vmatprep.subr.bf16.mxu0 %v3005_v6 }
 0x7ca   :  { %v944_v2 = vpop.f32.mrf.mxu1 }
 0x7cc   :  { %v2731_v3 = vpop.f32.mrf.mxu1 }
 0x7ce   :  { %v947_v4 = vpop.f32.mrf.mxu1 }
 0x7d0   :  { %v2732_v5 = vpop.f32.mrf.mxu1 }
 0x858   :  { %v1047_v8 = vpop.f32.mrf.mxu1 }
 0x859   :  { %v1103_v9 = vsel %vm3117_vm4, %v1047_v8, -1e+30 }
 0x85a   :  { %v2743_v10 = vpop.f32.mrf.mxu1  ;;  %v1105_v12 = vsel %vm286_vm5, %v1103_v9, -inf }
 0x85b   :  { %1106 = vmax.xlane.f32.xlu0 %v1105_v12 }
 0x85c   :  { %v1050_v14 = vpop.f32.mrf.mxu1 }
 0x85e   :  { %v2744_v16 = vpop.f32.mrf.mxu1 }
 0x862   :  { %v896_v21 = vpop.f32.mrf.mxu0 }
 0x863   :  { %v950_v22 = vpack.c.bf16 %v944_v2, %v896_v21 }
 0x864   :  { %v2725_v23 = vpop.f32.mrf.mxu0 }
 0x865   :  { %2736 = vmatmul.mubr.msk.bf16.vlgmr.msra.gmra.mxu0 %vm189_vm2, %v950_v22 }
 0x866   :  { %2746 = vmatpush3.bf16.xpose.msra.mxu0 %v1061_v26  ;;  %v899_v27 = vpop.f32.mrf.mxu0  ;;  %2747 = vmatprep.mubr.msk.bf16.mxu0 %vm3006_vm1, %v3005_v6 }
 0x867   :  { %2757 = vmatprep.subr.bf16.mxu0 %v3005_v6 }
 0x868   :  { %v2726_v28 = vpop.f32.mrf.mxu0 }
 0x86d   :  { %2748 = vmatmul.mubr.msk.bf16.vlgmr.msra.gmra.mxu0 %vm189_vm2, %v1054_v31 }
 0x86e   :  { %2759 = vmatprep.mubr.msk.bf16.mxu0 %vm3006_vm1, %v3005_v6 }
 0x8e4   :  { %v1107_v33 = vpop.xlane.xlu0 %1106 }
 0x8e5   :  { %v1111_v34 = vsub.f32 %v1103_v9, %v1107_v33 }
 0x8e7   :  { %v1113_v35 = vmul.f32 1.442695, %v1111_v34 }
 0x8e9   :  { %2942 = vpow2.f32 %v1113_v35 }
 0x8f6   :  { %v2943_v37 = vpop.eup %2942 }
 0x8f7   :  { %v1117_v39 = vsel %vm286_vm5, %v2943_v37, 0.0 }
 0x8f8   :  { %1118 = vadd.xlane.f32.xlu0 %v1117_v39 }
 0x925   :  { %v994_v41 = vpop.f32.mrf.mxu0 }
 0x926   :  { %v3275_v42 = vadd.f32 %v994_v41, %v722_v40 }
 0x927   :  { %v2737_v43 = vpop.f32.mrf.mxu0 }
 0x929   :  { %v997_v45 = vpop.f32.mrf.mxu0 }
 0x92a   :  { %v3279_v46 = vadd.f32 %v997_v45, %v725_v44 }
 0x92b   :  { %v2738_v47 = vpop.f32.mrf.mxu0 }
 0x92d   :  { %v1097_v48 = vpop.f32.mrf.mxu0 }
 0x92e   :  { %v1104_v49 = vsel %vm3117_vm4, %v1097_v48, -1e+30 }
 0x92f   :  { %v2749_v50 = vpop.f32.mrf.mxu0  ;;  %v1108_v51 = vsel %vm286_vm5, %v1104_v49, -inf }
 0x930   :  { %1109 = vmax.xlane.f32.xlu1 %v1108_v51 }
 0x931   :  { %v1100_v11 = vpop.f32.mrf.mxu0 }
 0x933   :  { %v2750_v36 = vpop.f32.mrf.mxu0 }
 0x941   :  { %1177 = vrot.lane.b32.xlu1 %v3104_v25, %s3009_s9 }
 0x945   :  { %1280 = vrot.lane.b32.xlu1 %v3078_v13, %s3010_s12 }
 0x949   :  { %1330 = vrot.lane.b32.xlu1 %v3082_v17, %s3010_s12 }
 0x94d   :  { %1328 = vrot.lane.b32.xlu1 %v3096_v20, %s3010_s12 }
 0x981   :  { %v1119_v57 = vpop.xlane.xlu0 %1118 }
 0x9b9   :  { %v1110_v15 = vpop.xlane.xlu1 %1109 }
 0x9ba   :  { %v1112_v38 = vsub.f32 %v1104_v49, %v1110_v15 }
 0x9bc   :  { %v1115_v52 = vmul.f32 1.442695, %v1112_v38 }
 0x9bd   :  { %v1178_v53 = vpop.permute.xlu1 %1177 }
 0x9be   :  { %2944 = vpow2.f32 %v1115_v52  ;;  %v1183_v54 = vsel %vm314_vm3, %v1178_v53, 0 }
 0x9bf   :  { %2758 = vmatpush3.bf16.msra.mxu0 %v1183_v54  ;;  %2946 = vrcp.f32 %v1119_v57 }
 0x9c0   :  { %2769 = vmatprep.subr.bf16.mxu0 %v3005_v6 }
 0x9c1   :  { %v1281_v2 = vpop.permute.xlu1 %1280 }
 0x9c2   :  { %v1286_v4 = vsel %vm189_vm2, %v1281_v2, 0 }
 0x9c5   :  { %v1331_v14 = vpop.permute.xlu1 %1330 }
 0x9c6   :  { %v1336_v22 = vsel %vm189_vm2, %v1331_v14, 0 }
 0x9c9   :  { %v1329_v31 = vpop.permute.xlu1 %1328 }
 0x9cb   :  { %v2945_v55 = vpop.eup %2944 }
 0x9cc   :  { %v1120_v56 = vsel %vm286_vm5, %v2945_v55, 0.0  ;;  %v2947_v58 = vpop.eup %2946 }
 0x9cd   :  { %1121 = vadd.xlane.f32.xlu0 %v1120_v56  ;;  %v1125_v60 = vmul.f32 %v2947_v58, %v2943_v37 }
 0x9cf   :  { %v1127_v63 = vpack.c.bf16 %v1125_v60, %v1125_v60 }
 0x9e3   :  { %1129 = vrot.lane.b32.xlu0 %v3102_v24, %s3009_s9 }
 0x9e7   :  { %1278 = vrot.lane.b32.xlu0 %v3089_v19, %s3010_s12 }
 0xa56   :  { %v1122_v59 = vpop.xlane.xlu0 %1121 }
 0xa57   :  { %2948 = vrcp.f32 %v1122_v59 }
 0xa5a   :  { %v1130_v61 = vpop.permute.xlu0 %1129 }
 0xa5b   :  { %v1135_v62 = vsel %vm314_vm3, %v1130_v61, 0 }
 0xa5c   :  { %2752 = vmatpush3.bf16.msra.mxu1 %v1135_v62 }
 0xa5d   :  { %2763 = vmatprep.subr.bf16.mxu1 %v3005_v6 }
 0xa5e   :  { %v1279_v5 = vpop.permute.xlu0 %1278 }
 0xa5f   :  { %2754 = vmatmul.mubr.msk.bf16.vlgmr.msra.gmra.mxu1 %vm286_vm5, %v1127_v63 }
 0xa60   :  { %2765 = vmatprep.mubr.msk.bf16.mxu1 %vm3006_vm1, %v3005_v6  ;;  %2764 = vmatpush3.bf16.msra.mxu1 %v2913_v7 }
 0xa61   :  { %2775 = vmatprep.subr.bf16.mxu1 %v3005_v6 }
 0xa64   :  { %v2949_v0 = vpop.eup %2948 }
 0xa65   :  { %v1126_v1 = vmul.f32 %v2949_v0, %v2945_v55 }
 0xa67   :  { %v1128_v3 = vpack.c.bf16 %v1126_v1, %v1126_v1 }
 0xa69   :  { %2760 = vmatmul.mubr.msk.bf16.vlgmr.msra.gmra.mxu0 %vm286_vm5, %v1128_v3 }
 0xa6a   :  { %2770 = vmatpush3.bf16.xpose.msra.mxu0 %v1286_v4  ;;  %2771 = vmatprep.mubr.msk.bf16.mxu0 %vm3006_vm1, %v3005_v6 }
 0xa6b   :  { %2781 = vmatprep.subr.bf16.mxu0 %v3005_v6 }
 0xa71   :  { %2772 = vmatmul.mubr.msk.bf16.vlgmr.msra.gmra.mxu0 %vm189_vm2, %v1279_v5 }
 0xa72   :  { %2783 = vmatprep.mubr.msk.bf16.mxu0 %vm3006_vm1, %v3005_v6 }
 0xb1f   :  { %v1171_v8 = vpop.f32.mrf.mxu1 }
 0xb21   :  { %v2755_v9 = vpop.f32.mrf.mxu1 }
 0xb22   :  { %v2914_v9 = vld [vmem:[%s3536_s2 + $0x20] sm:$0xff]  }
 0xb23   :  { %v1174_v10 = vpop.f32.mrf.mxu1 }
 0xb25   :  { %v2756_v12 = vpop.f32.mrf.mxu1 }
 0xb29   :  { %v1219_v16 = vpop.f32.mrf.mxu0 }
 0xb2a   :  { %v1225_v18 = vpack.c.bf16 %v1219_v16, %v1171_v8 }
 0xb2b   :  { %v2761_v21 = vpop.f32.mrf.mxu0 }
 0xb2c   :  { %2766 = vmatmul.mubr.msk.bf16.vlgmr.msra.gmra.mxu1 %vm189_vm2, %v1225_v18 }
 0xb2d   :  { %2776 = vmatpush3.bf16.xpose.msra.mxu1 %v1336_v22  ;;  %v1222_v23 = vpop.f32.mrf.mxu0  ;;  %2777 = vmatprep.mubr.msk.bf16.mxu1 %vm3006_vm1, %v3005_v6 }
 0xb2e   :  { %2787 = vmatprep.subr.bf16.mxu1 %v3005_v6 }
 0xb2f   :  { %v2762_v26 = vpop.f32.mrf.mxu0 }
 0xb31   :  { %v1322_v27 = vpop.f32.mrf.mxu0 }
 0xb32   :  { %v1378_v28 = vsel %vm3117_vm4, %v1322_v27, -1e+30 }
 0xb33   :  { %v2773_v33 = vpop.f32.mrf.mxu0  ;;  %v1380_v34 = vsel %vm286_vm5, %v1378_v28, -inf }
 0xb34   :  { %1381 = vmax.xlane.f32.xlu0 %v1380_v34  ;;  %2778 = vmatmul.mubr.msk.bf16.vlgmr.msra.gmra.mxu1 %vm189_vm2, %v1329_v31 }
 0xb35   :  { %v1325_v35 = vpop.f32.mrf.mxu0  ;;  %2789 = vmatprep.mubr.msk.bf16.mxu1 %vm3006_vm1, %v3005_v6 }
 0xb37   :  { %v2774_v37 = vpop.f32.mrf.mxu0 }
 0xbbd   :  { %v1382_v39 = vpop.xlane.xlu0 %1381 }
 0xbbe   :  { %v1386_v40 = vsub.f32 %v1378_v28, %v1382_v39 }
 0xbc0   :  { %v1388_v41 = vmul.f32 1.442695, %v1386_v40 }
 0xbc2   :  { %2950 = vpow2.f32 %v1388_v41 }
 0xbcf   :  { %v2951_v43 = vpop.eup %2950 }
 0xbd0   :  { %v1392_v44 = vsel %vm286_vm5, %v2951_v43, 0.0 }
 0xbd1   :  { %1393 = vadd.xlane.f32.xlu0 %v1392_v44 }
 0xbec   :  { %v1269_v45 = vpop.f32.mrf.mxu1 }
 0xbed   :  { %v3329_v47 = vadd.f32 %v1269_v45, %v3275_v42 }
 0xbee   :  { %v2767_v48 = vpop.f32.mrf.mxu1 }
 0xbf0   :  { %v1272_v49 = vpop.f32.mrf.mxu1 }
 0xbf1   :  { %v3332_v50 = vadd.f32 %v1272_v49, %v3279_v46 }
 0xbf2   :  { %v2768_v51 = vpop.f32.mrf.mxu1 }
 0xbf4   :  { %v1372_v11 = vpop.f32.mrf.mxu1 }
 0xbf5   :  { %v1379_v36 = vsel %vm3117_vm4, %v1372_v11, -1e+30 }
 0xbf6   :  { %v2779_v15 = vpop.f32.mrf.mxu1  ;;  %v1383_v38 = vsel %vm286_vm5, %v1379_v36, -inf }
 0xbf7   :  { %1384 = vmax.xlane.f32.xlu1 %v1383_v38 }
 0xbf8   :  { %v1375_v52 = vpop.f32.mrf.mxu1 }
 0xbfa   :  { %v2780_v53 = vpop.f32.mrf.mxu1 }
 0xc08   :  { %1452 = vrot.lane.b32.xlu1 %v3104_v25, %s3010_s12 }
 0xc0c   :  { %1555 = vrot.lane.b32.xlu1 %v3078_v13, %s3011_s15 }
 0xc10   :  { %1605 = vrot.lane.b32.xlu1 %v3082_v17, %s3011_s15 }
 0xc14   :  { %1603 = vrot.lane.b32.xlu1 %v3096_v20, %s3011_s15 }
 0xc5a   :  { %v1394_v59 = vpop.xlane.xlu0 %1393 }
 0xc80   :  { %v1385_v42 = vpop.xlane.xlu1 %1384 }
 0xc81   :  { %v1387_v46 = vsub.f32 %v1379_v36, %v1385_v42 }
 0xc83   :  { %v1390_v54 = vmul.f32 1.442695, %v1387_v46 }
 0xc84   :  { %v1453_v55 = vpop.permute.xlu1 %1452 }
 0xc85   :  { %2952 = vpow2.f32 %v1390_v54  ;;  %v1458_v56 = vsel %vm314_vm3, %v1453_v55, 0 }
 0xc86   :  { %2788 = vmatpush3.bf16.msra.mxu1 %v1458_v56  ;;  %2954 = vrcp.f32 %v1394_v59 }
 0xc87   :  { %2799 = vmatprep.subr.bf16.mxu1 %v3005_v6 }
 0xc88   :  { %v1556_v4 = vpop.permute.xlu1 %1555 }
 0xc89   :  { %v1561_v7 = vsel %vm189_vm2, %v1556_v4, 0 }
 0xc8c   :  { %v1606_v18 = vpop.permute.xlu1 %1605 }
 0xc8d   :  { %v1611_v26 = vsel %vm189_vm2, %v1606_v18, 0 }
 0xc90   :  { %v1604_v34 = vpop.permute.xlu1 %1603 }
 0xc92   :  { %v2953_v57 = vpop.eup %2952 }
 0xc93   :  { %v1395_v58 = vsel %vm286_vm5, %v2953_v57, 0.0  ;;  %v2955_v60 = vpop.eup %2954 }
 0xc94   :  { %1396 = vadd.xlane.f32.xlu0 %v1395_v58  ;;  %v1400_v62 = vmul.f32 %v2955_v60, %v2951_v43 }
 0xc96   :  { %v1402_v1 = vpack.c.bf16 %v1400_v62, %v1400_v62 }
 0xcaa   :  { %1404 = vrot.lane.b32.xlu0 %v3102_v24, %s3010_s12 }
 0xcae   :  { %1553 = vrot.lane.b32.xlu0 %v3089_v19, %s3011_s15 }
 0xd1d   :  { %v1397_v61 = vpop.xlane.xlu0 %1396 }
 0xd1e   :  { %2956 = vrcp.f32 %v1397_v61 }
 0xd21   :  { %v1405_v63 = vpop.permute.xlu0 %1404 }
 0xd22   :  { %v1410_v0 = vsel %vm314_vm3, %v1405_v63, 0 }
 0xd23   :  { %2782 = vmatpush3.bf16.msra.mxu0 %v1410_v0 }
 0xd24   :  { %2793 = vmatprep.subr.bf16.mxu0 %v3005_v6 }
 0xd25   :  { %v1554_v8 = vpop.permute.xlu0 %1553 }
 0xd26   :  { %2784 = vmatmul.mubr.msk.bf16.vlgmr.msra.gmra.mxu0 %vm286_vm5, %v1402_v1 }
 0xd27   :  { %2795 = vmatprep.mubr.msk.bf16.mxu0 %vm3006_vm1, %v3005_v6  ;;  %2794 = vmatpush3.bf16.msra.mxu0 %v2914_v9 }
 0xd28   :  { %2805 = vmatprep.subr.bf16.mxu0 %v3005_v6 }
 0xd2b   :  { %v2957_v2 = vpop.eup %2956 }
 0xd2c   :  { %v1401_v3 = vmul.f32 %v2957_v2, %v2953_v57 }
 0xd2e   :  { %v1403_v5 = vpack.c.bf16 %v1401_v3, %v1401_v3 }
 0xd30   :  { %2790 = vmatmul.mubr.msk.bf16.vlgmr.msra.gmra.mxu1 %vm286_vm5, %v1403_v5 }
 0xd31   :  { %2800 = vmatpush3.bf16.xpose.msra.mxu1 %v1561_v7  ;;  %2801 = vmatprep.mubr.msk.bf16.mxu1 %vm3006_vm1, %v3005_v6 }
 0xd32   :  { %2811 = vmatprep.subr.bf16.mxu1 %v3005_v6 }
 0xd38   :  { %2802 = vmatmul.mubr.msk.bf16.vlgmr.msra.gmra.mxu1 %vm189_vm2, %v1554_v8 }
 0xd39   :  { %2813 = vmatprep.mubr.msk.bf16.mxu1 %vm3006_vm1, %v3005_v6 }
 0xde6   :  { %v1446_v10 = vpop.f32.mrf.mxu0 }
 0xde8   :  { %v2785_v12 = vpop.f32.mrf.mxu0 }
 0xde9   :  { %v2915_v12 = vld [vmem:[%s3536_s2 + $0x28] sm:$0xff]  }
 0xdea   :  { %v1449_v14 = vpop.f32.mrf.mxu0 }
 0xdec   :  { %v2786_v16 = vpop.f32.mrf.mxu0 }
 0xdf0   :  { %v1494_v21 = vpop.f32.mrf.mxu1 }
 0xdf1   :  { %v1500_v22 = vpack.c.bf16 %v1494_v21, %v1446_v10 }
 0xdf2   :  { %v2791_v23 = vpop.f32.mrf.mxu1 }
 0xdf3   :  { %2796 = vmatmul.mubr.msk.bf16.vlgmr.msra.gmra.mxu0 %vm189_vm2, %v1500_v22 }
 0xdf4   :  { %2806 = vmatpush3.bf16.xpose.msra.mxu0 %v1611_v26  ;;  %v1497_v27 = vpop.f32.mrf.mxu1  ;;  %2807 = vmatprep.mubr.msk.bf16.mxu0 %vm3006_vm1, %v3005_v6 }
 0xdf5   :  { %2817 = vmatprep.subr.bf16.mxu0 %v3005_v6 }
 0xdf6   :  { %v2792_v28 = vpop.f32.mrf.mxu1 }
 0xdf8   :  { %v1597_v31 = vpop.f32.mrf.mxu1 }
 0xdf9   :  { %v1653_v33 = vsel %vm3117_vm4, %v1597_v31, -1e+30 }
 0xdfa   :  { %v2803_v35 = vpop.f32.mrf.mxu1  ;;  %v1655_v37 = vsel %vm286_vm5, %v1653_v33, -inf }
 0xdfb   :  { %2808 = vmatmul.mubr.msk.bf16.vlgmr.msra.gmra.mxu0 %vm189_vm2, %v1604_v34  ;;  %1656 = vmax.xlane.f32.xlu0 %v1655_v37 }
 0xdfc   :  { %v1600_v39 = vpop.f32.mrf.mxu1  ;;  %2819 = vmatprep.mubr.msk.bf16.mxu0 %vm3006_vm1, %v3005_v6 }
 0xdfe   :  { %v2804_v40 = vpop.f32.mrf.mxu1 }
 0xe84   :  { %v1657_v41 = vpop.xlane.xlu0 %1656 }
 0xe85   :  { %v1661_v43 = vsub.f32 %v1653_v33, %v1657_v41 }
 0xe87   :  { %v1663_v44 = vmul.f32 1.442695, %v1661_v43 }
 0xe89   :  { %2958 = vpow2.f32 %v1663_v44 }
 0xe96   :  { %v2959_v45 = vpop.eup %2958 }
 0xe97   :  { %v1667_v48 = vsel %vm286_vm5, %v2959_v45, 0.0 }
 0xe98   :  { %1668 = vadd.xlane.f32.xlu0 %v1667_v48 }
 0xeb3   :  { %v1544_v49 = vpop.f32.mrf.mxu0 }
 0xeb4   :  { %v3382_v51 = vadd.f32 %v1544_v49, %v3329_v47 }
 0xeb5   :  { %v2797_v11 = vpop.f32.mrf.mxu0 }
 0xeb7   :  { %v1547_v36 = vpop.f32.mrf.mxu0 }
 0xeb8   :  { %v3385_v15 = vadd.f32 %v1547_v36, %v3332_v50 }
 0xeb9   :  { %v2798_v38 = vpop.f32.mrf.mxu0 }
 0xebb   :  { %v1647_v52 = vpop.f32.mrf.mxu0 }
 0xebc   :  { %v1654_v53 = vsel %vm3117_vm4, %v1647_v52, -1e+30 }
 0xebd   :  { %v2809_v42 = vpop.f32.mrf.mxu0  ;;  %v1658_v46 = vsel %vm286_vm5, %v1654_v53, -inf }
 0xebe   :  { %1659 = vmax.xlane.f32.xlu1 %v1658_v46 }
 0xebf   :  { %v1650_v54 = vpop.f32.mrf.mxu0 }
 0xec1   :  { %v2810_v55 = vpop.f32.mrf.mxu0 }
 0xecf   :  { %1727 = vrot.lane.b32.xlu1 %v3104_v25, %s3011_s15 }
 0xed3   :  { %1830 = vrot.lane.b32.xlu1 %v3078_v13, %s3012_s18 }
 0xed7   :  { %1880 = vrot.lane.b32.xlu1 %v3082_v17, %s3012_s18 }
 0xedb   :  { %1878 = vrot.lane.b32.xlu1 %v3096_v20, %s3012_s18 }
 0xf21   :  { %v1669_v61 = vpop.xlane.xlu0 %1668 }
 0xf47   :  { %v1660_v47 = vpop.xlane.xlu1 %1659 }
 0xf48   :  { %v1662_v50 = vsub.f32 %v1654_v53, %v1660_v47 }
 0xf4a   :  { %v1665_v56 = vmul.f32 1.442695, %v1662_v50 }
 0xf4b   :  { %v1728_v57 = vpop.permute.xlu1 %1727 }
 0xf4c   :  { %2960 = vpow2.f32 %v1665_v56  ;;  %v1733_v58 = vsel %vm314_vm3, %v1728_v57, 0 }
 0xf4d   :  { %2818 = vmatpush3.bf16.msra.mxu0 %v1733_v58  ;;  %2962 = vrcp.f32 %v1669_v61 }
 0xf4e   :  { %2829 = vmatprep.subr.bf16.mxu0 %v3005_v6 }
 0xf4f   :  { %v1831_v7 = vpop.permute.xlu1 %1830 }
 0xf50   :  { %v1836_v9 = vsel %vm189_vm2, %v1831_v7, 0 }
 0xf53   :  { %v1881_v22 = vpop.permute.xlu1 %1880 }
 0xf54   :  { %v1886_v28 = vsel %vm189_vm2, %v1881_v22, 0 }
 0xf57   :  { %v1879_v37 = vpop.permute.xlu1 %1878 }
 0xf59   :  { %v2961_v59 = vpop.eup %2960 }
 0xf5a   :  { %v1670_v60 = vsel %vm286_vm5, %v2961_v59, 0.0  ;;  %v2963_v62 = vpop.eup %2962 }
 0xf5b   :  { %1671 = vadd.xlane.f32.xlu0 %v1670_v60  ;;  %v1675_v0 = vmul.f32 %v2963_v62, %v2959_v45 }
 0xf5d   :  { %v1677_v3 = vpack.c.bf16 %v1675_v0, %v1675_v0 }
 0xf71   :  { %1679 = vrot.lane.b32.xlu0 %v3102_v24, %s3011_s15 }
 0xf75   :  { %1828 = vrot.lane.b32.xlu0 %v3089_v19, %s3012_s18 }
 0xfe4   :  { %v1672_v63 = vpop.xlane.xlu0 %1671 }
 0xfe5   :  { %2964 = vrcp.f32 %v1672_v63 }
 0xfe8   :  { %v1680_v1 = vpop.permute.xlu0 %1679 }
 0xfe9   :  { %v1685_v2 = vsel %vm314_vm3, %v1680_v1, 0 }
 0xfea   :  { %2812 = vmatpush3.bf16.msra.mxu1 %v1685_v2 }
 0xfeb   :  { %2823 = vmatprep.subr.bf16.mxu1 %v3005_v6 }
 0xfec   :  { %v1829_v10 = vpop.permute.xlu0 %1828 }
 0xfed   :  { %2814 = vmatmul.mubr.msk.bf16.vlgmr.msra.gmra.mxu1 %vm286_vm5, %v1677_v3 }
 0xfee   :  { %2825 = vmatprep.mubr.msk.bf16.mxu1 %vm3006_vm1, %v3005_v6  ;;  %2824 = vmatpush3.bf16.msra.mxu1 %v2915_v12 }
 0xfef   :  { %2835 = vmatprep.subr.bf16.mxu1 %v3005_v6 }
 0xff2   :  { %v2965_v4 = vpop.eup %2964 }
 0xff3   :  { %v1676_v5 = vmul.f32 %v2965_v4, %v2961_v59 }
 0xff5   :  { %v1678_v8 = vpack.c.bf16 %v1676_v5, %v1676_v5 }
 0xff7   :  { %2820 = vmatmul.mubr.msk.bf16.vlgmr.msra.gmra.mxu0 %vm286_vm5, %v1678_v8 }
 0xff8   :  { %2830 = vmatpush3.bf16.xpose.msra.mxu0 %v1836_v9  ;;  %2831 = vmatprep.mubr.msk.bf16.mxu0 %vm3006_vm1, %v3005_v6  ;;  %v2916_v9 = vld [vmem:[%s3536_s2 + $0x30] sm:$0xff]  }
 0xff9   :  { %2841 = vmatprep.subr.bf16.mxu0 %v3005_v6 }
 0xfff   :  { %2832 = vmatmul.mubr.msk.bf16.vlgmr.msra.gmra.mxu0 %vm189_vm2, %v1829_v10 }
0x1000   :  { %2843 = vmatprep.mubr.msk.bf16.mxu0 %vm3006_vm1, %v3005_v6 }
0x10ad   :  { %v1721_v14 = vpop.f32.mrf.mxu1 }
0x10af   :  { %v2815_v16 = vpop.f32.mrf.mxu1 }
0x10b1   :  { %v1724_v18 = vpop.f32.mrf.mxu1 }
0x10b3   :  { %v2816_v21 = vpop.f32.mrf.mxu1 }
0x10b7   :  { %v1769_v23 = vpop.f32.mrf.mxu0 }
0x10b8   :  { %v1775_v26 = vpack.c.bf16 %v1769_v23, %v1721_v14 }
0x10b9   :  { %v2821_v27 = vpop.f32.mrf.mxu0 }
0x10ba   :  { %2826 = vmatmul.mubr.msk.bf16.vlgmr.msra.gmra.mxu1 %vm189_vm2, %v1775_v26 }
0x10bb   :  { %2836 = vmatpush3.bf16.xpose.msra.mxu1 %v1886_v28  ;;  %v1772_v31 = vpop.f32.mrf.mxu0  ;;  %2837 = vmatprep.mubr.msk.bf16.mxu1 %vm3006_vm1, %v3005_v6 }
0x10bc   :  { %2847 = vmatprep.subr.bf16.mxu1 %v3005_v6 }
0x10bd   :  { %v2822_v33 = vpop.f32.mrf.mxu0 }
0x10bf   :  { %v1872_v34 = vpop.f32.mrf.mxu0 }
0x10c0   :  { %v1928_v35 = vsel %vm3117_vm4, %v1872_v34, -1e+30 }
0x10c1   :  { %v2833_v39 = vpop.f32.mrf.mxu0  ;;  %v1930_v40 = vsel %vm286_vm5, %v1928_v35, -inf }
0x10c2   :  { %1931 = vmax.xlane.f32.xlu0 %v1930_v40  ;;  %2838 = vmatmul.mubr.msk.bf16.vlgmr.msra.gmra.mxu1 %vm189_vm2, %v1879_v37 }
0x10c3   :  { %v1875_v41 = vpop.f32.mrf.mxu0  ;;  %2849 = vmatprep.mubr.msk.bf16.mxu1 %vm3006_vm1, %v3005_v6 }
0x10c5   :  { %v2834_v43 = vpop.f32.mrf.mxu0 }
0x114b   :  { %v1932_v44 = vpop.xlane.xlu0 %1931 }
0x114c   :  { %v1936_v45 = vsub.f32 %v1928_v35, %v1932_v44 }
0x114e   :  { %v1938_v48 = vmul.f32 1.442695, %v1936_v45 }
0x1150   :  { %2966 = vpow2.f32 %v1938_v48 }
0x115d   :  { %v2967_v49 = vpop.eup %2966 }
0x115e   :  { %v1942_v11 = vsel %vm286_vm5, %v2967_v49, 0.0 }
0x115f   :  { %1943 = vadd.xlane.f32.xlu0 %v1942_v11 }
0x117a   :  { %v1819_v36 = vpop.f32.mrf.mxu1 }
0x117b   :  { %v3435_v38 = vadd.f32 %v1819_v36, %v3382_v51 }
0x117c   :  { %v2827_v52 = vpop.f32.mrf.mxu1 }
0x117e   :  { %v1822_v53 = vpop.f32.mrf.mxu1 }
0x117f   :  { %v3438_v42 = vadd.f32 %v1822_v53, %v3385_v15 }
0x1180   :  { %v2828_v46 = vpop.f32.mrf.mxu1 }
0x1182   :  { %v1922_v54 = vpop.f32.mrf.mxu1 }
0x1183   :  { %v1929_v55 = vsel %vm3117_vm4, %v1922_v54, -1e+30 }
0x1184   :  { %v2839_v47 = vpop.f32.mrf.mxu1  ;;  %v1933_v50 = vsel %vm286_vm5, %v1929_v55, -inf }
0x1185   :  { %1934 = vmax.xlane.f32.xlu1 %v1933_v50 }
0x1186   :  { %v1925_v56 = vpop.f32.mrf.mxu1 }
0x1188   :  { %v2840_v57 = vpop.f32.mrf.mxu1 }
0x1196   :  { %2002 = vrot.lane.b32.xlu1 %v3104_v25, %s3012_s18 }
0x119a   :  { %2105 = vrot.lane.b32.xlu1 %v3078_v13, %s3013_s21 }
0x119e   :  { %2155 = vrot.lane.b32.xlu1 %v3082_v17, %s3013_s21 }
0x11a2   :  { %2153 = vrot.lane.b32.xlu1 %v3096_v20, %s3013_s21 }
0x11e8   :  { %v1944_v13 = vpop.xlane.xlu0 %1943 }
0x120e   :  { %v1935_v51 = vpop.xlane.xlu1 %1934 }
0x120f   :  { %v1937_v15 = vsub.f32 %v1929_v55, %v1935_v51 }
0x1211   :  { %v1940_v58 = vmul.f32 1.442695, %v1937_v15 }
0x1212   :  { %v2003_v59 = vpop.permute.xlu1 %2002 }
0x1213   :  { %2968 = vpow2.f32 %v1940_v58  ;;  %v2008_v60 = vsel %vm314_vm3, %v2003_v59, 0 }
0x1214   :  { %2848 = vmatpush3.bf16.msra.mxu1 %v2008_v60  ;;  %2970 = vrcp.f32 %v1944_v13 }
0x1215   :  { %2859 = vmatprep.subr.bf16.mxu1 %v3005_v6 }
0x1216   :  { %v2106_v4 = vpop.permute.xlu1 %2105 }
0x1217   :  { %v2111_v7 = vsel %vm189_vm2, %v2106_v4, 0 }
0x121a   :  { %v2156_v18 = vpop.permute.xlu1 %2155 }
0x121b   :  { %v2161_v26 = vsel %vm189_vm2, %v2156_v18, 0 }
0x121e   :  { %v2154_v34 = vpop.permute.xlu1 %2153 }
0x1220   :  { %v2969_v61 = vpop.eup %2968 }
0x1221   :  { %v1945_v62 = vsel %vm286_vm5, %v2969_v61, 0.0  ;;  %v2971_v17 = vpop.eup %2970 }
0x1222   :  { %1946 = vadd.xlane.f32.xlu0 %v1945_v62  ;;  %v1950_v63 = vmul.f32 %v2971_v17, %v2967_v49 }
0x1224   :  { %v1952_v2 = vpack.c.bf16 %v1950_v63, %v1950_v63 }
0x1238   :  { %1954 = vrot.lane.b32.xlu0 %v3102_v24, %s3012_s18 }
0x123c   :  { %2103 = vrot.lane.b32.xlu0 %v3089_v19, %s3013_s21 }
0x12ab   :  { %v1947_v20 = vpop.xlane.xlu0 %1946 }
0x12ac   :  { %2972 = vrcp.f32 %v1947_v20 }
0x12af   :  { %v1955_v0 = vpop.permute.xlu0 %1954 }
0x12b0   :  { %v1960_v1 = vsel %vm314_vm3, %v1955_v0, 0 }
0x12b1   :  { %2842 = vmatpush3.bf16.msra.mxu0 %v1960_v1  ;;  %v2917_v1 = vld [vmem:[%s3536_s2 + $0x38] sm:$0xff]   ;;  %s3015_s2 = smov [#allocation2]  }
0x12b2   :  { %2853 = vmatprep.subr.bf16.mxu0 %v3005_v6 }
0x12b3   :  { %v2104_v8 = vpop.permute.xlu0 %2103 }
0x12b4   :  { %2844 = vmatmul.mubr.msk.bf16.vlgmr.msra.gmra.mxu0 %vm286_vm5, %v1952_v2 }
0x12b5   :  { %2855 = vmatprep.mubr.msk.bf16.mxu0 %vm3006_vm1, %v3005_v6  ;;  %2854 = vmatpush3.bf16.msra.mxu0 %v2916_v9 }
0x12b6   :  { %2865 = vmatprep.subr.bf16.mxu0 %v3005_v6 }
0x12b9   :  { %v2973_v3 = vpop.eup %2972 }
0x12ba   :  { %v1951_v19 = vmul.f32 %v2973_v3, %v2969_v61 }
0x12bc   :  { %v1953_v5 = vpack.c.bf16 %v1951_v19, %v1951_v19 }
0x12be   :  { %2850 = vmatmul.mubr.msk.bf16.vlgmr.msra.gmra.mxu1 %vm286_vm5, %v1953_v5 }
0x12bf   :  { %2860 = vmatpush3.bf16.xpose.msra.mxu1 %v2111_v7  ;;  %2861 = vmatprep.mubr.msk.bf16.mxu1 %vm3006_vm1, %v3005_v6 }
0x12c0   :  { %2871 = vmatprep.subr.bf16.mxu1 %v3005_v6 }
0x12c6   :  { %2862 = vmatmul.mubr.msk.bf16.vlgmr.msra.gmra.mxu1 %vm189_vm2, %v2104_v8 }
0x12c7   :  { %2873 = vmatprep.mubr.msk.bf16.mxu1 %vm3006_vm1, %v3005_v6 }
0x1374   :  { %v1996_v10 = vpop.f32.mrf.mxu0 }
0x1376   :  { %v2845_v12 = vpop.f32.mrf.mxu0 }
0x1377   :  { %v2551_v12 = vld [vmem:[%s3537_s3] ss:$0 sm:$0xff]  ;;  %s2478_s3 = sshll.u32 %s3015_s2, 4  ;;  %s2479_s3 = int_to_ptr.vmem [resolvable:$true] %s2478_s3 }
0x1378   :  { %v1999_v14 = vpop.f32.mrf.mxu0  ;;  %s2982_s28 = scalar_lea.vmem %s2479_s3, 64  ;;  %p2987_p1 = scmp.lt.s32.totalorder %s2479_s3, %s2479_s3 }
0x1379   :  { %p2983_p0 = scmp.ne.s32.totalorder %s2479_s3, %s2982_s28  ;;  %p2988_p2 = scmp.lt.s32.totalorder %s2982_s28, %s2982_s28 }
0x137a   :  { %v2846_v16 = vpop.f32.mrf.mxu0 }
0x137b   :  { %p2989_p3 = por %p2988_p2, %p2987_p1 }
0x137d   :  { %p2990_p4 = pnand %p2989_p3, %p2983_p0 }
0x137e   :  { %v2044_v21 = vpop.f32.mrf.mxu1 }
0x137f   :  { %v2050_v22 = vpack.c.bf16 %v2044_v21, %v1996_v10 }
0x1380   :  { %v2851_v23 = vpop.f32.mrf.mxu1 }
0x1381   :  { %2856 = vmatmul.mubr.msk.bf16.vlgmr.msra.gmra.mxu0 %vm189_vm2, %v2050_v22 }
0x1382   :  { %2866 = vmatpush3.bf16.xpose.msra.mxu0 %v2161_v26  ;;  %v2047_v27 = vpop.f32.mrf.mxu1  ;;  %2867 = vmatprep.mubr.msk.bf16.mxu0 %vm3006_vm1, %v3005_v6 }
0x1383   :  { %2877 = vmatprep.subr.bf16.mxu0 %v3005_v6 }
0x1384   :  { %v2852_v28 = vpop.f32.mrf.mxu1 }
0x1386   :  { %v2147_v31 = vpop.f32.mrf.mxu1 }
0x1387   :  { %v2203_v33 = vsel %vm3117_vm4, %v2147_v31, -1e+30 }
0x1388   :  { %v2863_v35 = vpop.f32.mrf.mxu1  ;;  %v2205_v37 = vsel %vm286_vm5, %v2203_v33, -inf }
0x1389   :  { %2868 = vmatmul.mubr.msk.bf16.vlgmr.msra.gmra.mxu0 %vm189_vm2, %v2154_v34  ;;  %2206 = vmax.xlane.f32.xlu0 %v2205_v37 }
0x138a   :  { %v2150_v39 = vpop.f32.mrf.mxu1  ;;  %2879 = vmatprep.mubr.msk.bf16.mxu0 %vm3006_vm1, %v3005_v6 }
0x138c   :  { %v2864_v40 = vpop.f32.mrf.mxu1 }
0x1412   :  { %v2207_v41 = vpop.xlane.xlu0 %2206 }
0x1413   :  { %v2211_v43 = vsub.f32 %v2203_v33, %v2207_v41 }
0x1415   :  { %v2213_v44 = vmul.f32 1.442695, %v2211_v43 }
0x1417   :  { %2974 = vpow2.f32 %v2213_v44 }
0x1424   :  { %v2975_v45 = vpop.eup %2974 }
0x1425   :  { %v2217_v48 = vsel %vm286_vm5, %v2975_v45, 0.0 }
0x1426   :  { %2218 = vadd.xlane.f32.xlu0 %v2217_v48 }
0x1441   :  { %v2094_v49 = vpop.f32.mrf.mxu0 }
0x1442   :  { %v2101_v11 = vadd.f32 %v2094_v49, %v3435_v38 }
0x1443   :  { %v2857_v36 = vpop.f32.mrf.mxu0 }
0x1445   :  { %v2097_v52 = vpop.f32.mrf.mxu0 }
0x1446   :  { %v2102_v53 = vadd.f32 %v2097_v52, %v3438_v42 }
0x1447   :  { %v2858_v46 = vpop.f32.mrf.mxu0 }
0x1449   :  { %v2197_v54 = vpop.f32.mrf.mxu0 }
0x144a   :  { %v2204_v55 = vsel %vm3117_vm4, %v2197_v54, -1e+30 }
0x144b   :  { %v2869_v47 = vpop.f32.mrf.mxu0  ;;  %v2208_v50 = vsel %vm286_vm5, %v2204_v55, -inf }
0x144c   :  { %2209 = vmax.xlane.f32.xlu1 %v2208_v50 }
0x144d   :  { %v2200_v56 = vpop.f32.mrf.mxu0 }
0x144f   :  { %v2870_v57 = vpop.f32.mrf.mxu0 }
0x1450   :  { %v3014_v57 = vmov 1966171168  }
0x145d   :  { %2277 = vrot.lane.b32.xlu1 %v3104_v25, %s3013_s21 }
0x14af   :  { %v2219_v60 = vpop.xlane.xlu0 %2218 }
0x14d5   :  { %v2210_v51 = vpop.xlane.xlu1 %2209 }
0x14d6   :  { %v2212_v38 = vsub.f32 %v2204_v55, %v2210_v51  ;;  %v2444_v51 = vunpack.c.l.s4 %v3014_v57 }
0x14d8   :  { %v2215_v15 = vmul.f32 1.442695, %v2212_v38 }
0x14d9   :  { %v2278_v58 = vpop.permute.xlu1 %2277 }
0x14da   :  { %2976 = vpow2.f32 %v2215_v15  ;;  %v2283_v42 = vsel %vm314_vm3, %v2278_v58, 0  ;;  %v2445_v15 = vunpack.c.0.s8 %v2444_v51 }
0x14db   :  { %2878 = vmatpush3.bf16.msra.mxu0 %v2283_v42  ;;  %2978 = vrcp.f32 %v2219_v60 }
0x14e7   :  { %v2977_v59 = vpop.eup %2976 }
0x14e8   :  { %v2220_v32 = vsel %vm286_vm5, %v2977_v59, 0.0  ;;  %v2979_v61 = vpop.eup %2978 }
0x14e9   :  { %2221 = vadd.xlane.f32.xlu0 %v2220_v32  ;;  %v2225_v25 = vmul.f32 %v2979_v61, %v2975_v45  ;;  %v2448_v61 = vsub.s32 %v2445_v15, %v3113_v30 }
0x14eb   :  { %v2227_v20 = vpack.c.bf16 %v2225_v25, %v2225_v25 }
0x14ff   :  { %2229 = vrot.lane.b32.xlu0 %v3102_v24, %s3013_s21 }
0x1572   :  { %v2222_v62 = vpop.xlane.xlu0 %2221 }
0x1573   :  { %2980 = vrcp.f32 %v2222_v62 }
0x1576   :  { %v2230_v13 = vpop.permute.xlu0 %2229 }
0x1577   :  { %v2235_v17 = vsel %vm314_vm3, %v2230_v13, 0 }
0x1578   :  { %2872 = vmatpush3.bf16.msra.mxu1 %v2235_v17 }
0x1579   :  { %2883 = vmatprep.subr.bf16.mxu1 %v3005_v6 }
0x157b   :  { %2874 = vmatmul.mubr.msk.bf16.vlgmr.msra.gmra.mxu1 %vm286_vm5, %v2227_v20 }
0x157c   :  { %2885 = vmatprep.mubr.msk.bf16.mxu1 %vm3006_vm1, %v3005_v6  ;;  %2884 = vmatpush3.bf16.msra.mxu1 %v2917_v1 }
0x1580   :  { %v2981_v63 = vpop.eup %2980 }
0x1581   :  { %v2226_v24 = vmul.f32 %v2981_v63, %v2977_v59 }
0x1583   :  { %v2228_v0 = vpack.c.bf16 %v2226_v24, %v2226_v24 }
0x1585   :  { %2880 = vmatmul.mubr.msk.bf16.vlgmr.msra.gmra.mxu0 %vm286_vm5, %v2228_v0 }
0x163b   :  { %v2271_v2 = vpop.f32.mrf.mxu1 }
0x163d   :  { %v2875_v3 = vpop.f32.mrf.mxu1 }
0x163f   :  { %v2274_v19 = vpop.f32.mrf.mxu1 }
0x1641   :  { %v2876_v4 = vpop.f32.mrf.mxu1 }
0x1645   :  { %v2319_v5 = vpop.f32.mrf.mxu0 }
0x1646   :  { %v2325_v7 = vpack.c.bf16 %v2319_v5, %v2271_v2 }
0x1647   :  { %v2881_v8 = vpop.f32.mrf.mxu0 }
0x1648   :  { %2886 = vmatmul.mubr.msk.bf16.vlgmr.msra.gmra.mxu1 %vm189_vm2, %v2325_v7 }
0x1649   :  { %v2322_v6 = vpop.f32.mrf.mxu0 }
0x164b   :  { %v2882_v9 = vpop.f32.mrf.mxu0 }
0x1708   :  { %v2369_v10 = vpop.f32.mrf.mxu1 }
0x1709   :  { %v2376_v14 = vadd.f32 %v2369_v10, %v2101_v11 }
0x170a   :  { %v2887_v16 = vpop.f32.mrf.mxu1 }
0x170b   :  { %v2385_v18 = vadd.f32 %v2551_v12, %v2376_v14 }
0x170c   :  { %v2372_v21 = vpop.f32.mrf.mxu1 }
0x170d   :  { %v2377_v22 = vadd.f32 %v2372_v21, %v2102_v53  ;;  %v2393_v27 = vrot.slane %v2385_v18, 1  ;;  %v2398_v28 = vrot.slane %v2385_v18, 2  ;;  %v2414_v31 = vrot.slane %v2385_v18, 5 }
0x170e   :  { %v2888_v23 = vpop.f32.mrf.mxu1  ;;  %v2404_v33 = vrot.slane %v2385_v18, 3  ;;  %v2420_v34 = vrot.slane %v2385_v18, 6  ;;  %v2426_v35 = vrot.slane %v2385_v18, 7  ;;  %v2410_v37 = vrot.slane %v2385_v18, 4 }
0x170f   :  { %v2386_v26 = vadd.f32 %v2551_v12, %v2377_v22 }
0x1711   :  { %v2394_v39 = vsel %vm2390_vm6, %v2386_v26, %v2393_v27  ;;  %v2399_v40 = vrot.slane %v2386_v26, 1  ;;  %v2415_v41 = vrot.slane %v2386_v26, 4  ;;  %v2405_v43 = vrot.slane %v2386_v26, 2 }
0x1712   :  { %2395 = vrot.lane.b32.xlu1 %v2394_v39, %s3012_s18  ;;  %v2421_v44 = vrot.slane %v2386_v26, 5  ;;  %v2427_v45 = vrot.slane %v2386_v26, 6  ;;  %v2389_v48 = vrot.slane %v2386_v26, 7  ;;  %v2411_v49 = vrot.slane %v2386_v26, 3 }
0x1713   :  { %v2400_v11 = vsel %vm2390_vm6, %v2399_v40, %v2398_v28  ;;  %v2416_v36 = vsel %vm2390_vm6, %v2415_v41, %v2414_v31  ;;  %v2406_v52 = vsel %vm2390_vm6, %v2405_v43, %v2404_v33 }
0x1714   :  { %2401 = vrot.lane.b32.xlu0 %v2400_v11, %s3010_s12  ;;  %v2422_v53 = vsel %vm2390_vm6, %v2421_v44, %v2420_v34  ;;  %v2428_v46 = vsel %vm2390_vm6, %v2427_v45, %v2426_v35  ;;  %v2391_v54 = vsel %vm2390_vm6, %v2389_v48, %v2385_v18  ;;  %v2412_v55 = vsel %vm2390_vm6, %v2411_v49, %v2410_v37 }
0x1716   :  { %2417 = vrot.lane.b32.xlu1 %v2416_v36, %s3012_s18 }
0x1718   :  { %2407 = vrot.lane.b32.xlu0 %v2406_v52, %s3008_s1 }
0x171a   :  { %2423 = vrot.lane.b32.xlu1 %v2422_v53, %s3010_s12 }
0x171e   :  { %2429 = vrot.lane.b32.xlu1 %v2428_v46, %s3008_s1 }
0x1784   :  { %v2396_v47 = vpop.permute.xlu1 %2395 }
0x1785   :  { %v2432_v58 = vsel %vm62_vm0, %v2391_v54, %v2396_v47 }
0x1786   :  { %v2402_v50 = vpop.permute.xlu0 %2401 }
0x1787   :  { %v2434_v32 = vsel %vm2433_vm7, %v2432_v58, %v2402_v50 }
0x1788   :  { %v2418_v56 = vpop.permute.xlu1 %2417 }
0x1789   :  { %v2437_v59 = vsel %vm62_vm0, %v2412_v55, %v2418_v56 }
0x178a   :  { %v2408_v42 = vpop.permute.xlu0 %2407 }
0x178b   :  { %v2436_v25 = vsel %vm2435_vm8, %v2434_v32, %v2408_v42 }
0x178c   :  { %v2424_v38 = vpop.permute.xlu1 %2423 }
0x178d   :  { %v2438_v60 = vsel %vm2433_vm7, %v2437_v59, %v2424_v38 }
0x1790   :  { %v2430_v62 = vpop.permute.xlu1 %2429 }
0x1791   :  { %v2439_v13 = vsel %vm2435_vm8, %v2438_v60, %v2430_v62 }
0x1792   :  { %v2442_v17 = vcombine.low %v2436_v25, %v2439_v13 }
0x1794   :  { %v2449_v20 = vrot.slane %v2442_v17, %v2448_v61 }
0x1796   :  { %v2450_v63 = vcombine.high %v2449_v20, %v2449_v20  ;;  %v2457_v24 = vrot.slane %v2449_v20, %v2448_v61 }
0x1798   :  { %v2464_v0 = vrot.slane %v2450_v63, %v2448_v61  ;;  %2471 = vst.msk [vmem:[#allocation2] sm:$0x3] %vm2469_vm9, %v2457_v24 }
0x179a   :  { %2472 = vst.msk [vmem:[#allocation2 + $0x2] sm:$0x3] %vm2469_vm9, %v2464_v0 }
0x179b   :  { %2993 = shalt.err (!%p2990_p4)
}
0x179c   :  { %s3016_s29 = smov 2  }
0x179d   :  { %2484 = dma.vmem_to_hbm [thread:$0]  %s2479_s3, 64, %s3538_s4, [#allocation3], %s3012_s18, %s3012_s18, %s3016_s29  }
0x179e   :  { %3002 = dma.done.wait [#allocation3], 64  }
0x179f   :  { %3003 = vsyncadd [#allocation3], 4294967232 }
0x17a0   :  { %2488 = vsyncpa [#allocation3], 1 }

</bundles_post_ra>
